<compile_context>
chip_gen: v7x
topology: tpu7x:2x2x1
jax: 0.10.0
libtpu: 0.0.40
codegen_flags: <defaults>
</compile_context>

<pallas_src>
import functools

import jax
import jax.numpy as jnp
from jax.experimental import pallas as pl
from jax.experimental.pallas import tpu as pltpu


def _round_up(x, m):
    return (x + m - 1) // m * m


def sed_head_kernel(x_ref, m_ref, w1_ref, b1_ref, wac_ref, bac_ref,
                    clip_ref, cla_ref, *, n_seg, tp):
    # x_ref: (Cp, LANE_TILE) bf16 — freq-mean of encoder features; the lane
    # axis holds n_seg whole (time-padded to tp) batch segments.
    x = x_ref[...].astype(jnp.float32)
    lanes = x.shape[1]
    m = m_ref[...]
    lmask = m[0:1, :]                     # 1 where a left  neighbor exists
    rmask = m[1:2, :]                     # 1 where a right neighbor exists
    vmask = m[2:3, :]                     # 1 on valid (non-padded) lanes
    neg = jnp.float32(-1e30)

    # max_pool1d(3,1,1) + avg_pool1d(3,1,1): neighbors via XLU lane rotations,
    # folded into running max / sum accumulators (short live ranges).
    xn = pltpu.roll(x, 1, 1)                              # left neighbor
    x_max = jnp.maximum(x, jnp.where(lmask > 0.5, xn, neg))
    x_sum = x + xn * lmask
    xn = pltpu.roll(x, lanes - 1, 1)                      # right neighbor
    x_max = jnp.maximum(x_max, jnp.where(rmask > 0.5, xn, neg))
    x_sum = x_sum + xn * rmask
    xp = x_max + x_sum * jnp.float32(1.0 / 3.0)           # (Cp, lanes)

    # fc1 (Linear(C, C)) + ReLU, channel-major: h = relu(W1 @ xp + b1).
    h = jnp.dot(w1_ref[...], xp.astype(w1_ref.dtype),
                preferred_element_type=jnp.float32) + b1_ref[...]
    h = jnp.maximum(h, 0.0)                               # (Cp, lanes)

    # AttBlockV2: fused att/cla 1x1 convs == one (2*Kp, Cp) matmul.
    ac = jnp.dot(wac_ref[...], h.astype(wac_ref.dtype),
                 preferred_element_type=jnp.float32) + bac_ref[...]
    kp = clip_ref.shape[1]
    att = jnp.tanh(ac[:kp, :])                            # (Kp, lanes)
    cla = ac[kp:, :]                                      # (Kp, lanes), linear act
    cla_ref[...] = cla                                    # segmentwise logits

    # softmax over time within each batch segment: tanh bounds att to (-1,1),
    # so exp without max-subtraction is exact; padded lanes are zero-masked so
    # they cannot contribute to the per-segment sums.
    e = jnp.exp(att) * vmask                              # (Kp, lanes)
    denom = jnp.sum(e.reshape(kp, n_seg, tp), axis=-1)    # (Kp, n_seg)
    num = jnp.sum((e * cla).reshape(kp, n_seg, tp), axis=-1)
    clip_ref[0, :, :] = num / jnp.maximum(denom, jnp.float32(1e-30))


def _vmem_budget_bytes():
    try:
        kind = jax.devices()[0].device_kind.lower()
    except Exception:
        kind = ""
    if "v7" in kind:
        return 48 * 1024 * 1024          # v7x: 64 MiB physical VMEM per core
    return 100 * 1024 * 1024             # v5e / v6e: 128 MiB physical


def _working_set_bytes(cp, kp, lane_tile, n_seg, feat_bytes):
    dbl = 2                                               # double-buffered pipeline
    blocks = (cp * lane_tile * feat_bytes                 # feats block
              + 3 * lane_tile * 4                         # masks block
              + kp * lane_tile * 4                        # cla output block
              + kp * n_seg * 4) * dbl                     # clipwise output block
    weights = ((cp * cp + 2 * kp * cp) * 2 + (cp + 2 * kp) * 4) * dbl
    temps = 8 * cp * lane_tile * 4 + 3 * (2 * kp) * lane_tile * 4
    return blocks + weights + temps


def sed_head(feats, w1, b1, w_att, b_att, w_cla, b_cla,
             matmul_dtype=jnp.bfloat16, feats_dtype=jnp.bfloat16):
    """mean(freq) -> pools -> fc1 -> AttBlockV2, lane-tiled over batch*time."""
    B, C, Fq, T = feats.shape
    K = w_att.shape[0]
    Cp = _round_up(C, 128)               # MXU-aligned channel dim (all gens)
    Kp = _round_up(K, 8)                 # sublane-aligned head rows
    Tp = _round_up(T, 128)               # per-batch time segment (lane-aligned)
    feat_bytes = jnp.dtype(feats_dtype).itemsize

    # Lane tile = whole batch segments per grid step, sized to the VMEM budget.
    budget = _vmem_budget_bytes()
    n_seg = 1
    while (n_seg < B and (n_seg + 1) * Tp <= 4096
           and _working_set_bytes(Cp, Kp, (n_seg + 1) * Tp, n_seg + 1,
                                  feat_bytes) <= budget):
        n_seg += 1
    lane_tile = n_seg * Tp
    Bp = _round_up(B, n_seg)
    Np = Bp * Tp
    G = Np // lane_tile
    ws = _working_set_bytes(Cp, Kp, lane_tile, n_seg, feat_bytes)
    vmem_limit = int(min(budget, max(8 * 1024 * 1024, int(1.25 * ws))))

    # Frequency mean hoisted out of the kernel (drops the Fq axis before DMA).
    x = jnp.mean(feats, axis=2)                                      # (B, C, T)
    x = jnp.pad(x, ((0, Bp - B), (0, Cp - C), (0, Tp - T)))
    x = jnp.transpose(x, (1, 0, 2)).reshape(Cp, Np).astype(feats_dtype)

    # Per-lane pooling / validity masks (one tiny (3, lane_tile) DMA per step).
    lane = jnp.arange(Np)
    t = lane % Tp
    seg = lane // Tp
    valid = (seg < B) & (t < T)
    masks = jnp.stack([
        (valid & (t >= 1)).astype(jnp.float32),
        (valid & (t <= T - 2)).astype(jnp.float32),
        valid.astype(jnp.float32)], axis=0)                          # (3, Np)

    # Fused, padded weights: bf16 matmul operands, f32 biases.
    def pad2(mat, rows, cols):
        return jnp.pad(mat, ((0, rows - mat.shape[0]), (0, cols - mat.shape[1])))
    w1_p = pad2(w1, Cp, Cp).astype(matmul_dtype)
    b1_p = pad2(b1, Cp, 1)
    w_ac = jnp.concatenate([pad2(w_att, Kp, Cp), pad2(w_cla, Kp, Cp)],
                           axis=0).astype(matmul_dtype)
    b_ac = jnp.concatenate([pad2(b_att, Kp, 1), pad2(b_cla, Kp, 1)], axis=0)

    kernel = functools.partial(sed_head_kernel, n_seg=n_seg, tp=Tp)

    grid_spec = pltpu.PrefetchScalarGridSpec(
        num_scalar_prefetch=0,
        grid=(G,),
        in_specs=[
            pl.BlockSpec((Cp, lane_tile), lambda i: (0, i)),         # feats slab
            pl.BlockSpec((3, lane_tile), lambda i: (0, i)),          # masks
            pl.BlockSpec((Cp, Cp), lambda i: (0, 0)),                # w1 (resident)
            pl.BlockSpec((Cp, 1), lambda i: (0, 0)),                 # b1
            pl.BlockSpec((2 * Kp, Cp), lambda i: (0, 0)),            # w_att|w_cla
            pl.BlockSpec((2 * Kp, 1), lambda i: (0, 0)),             # b_att|b_cla
        ],
        out_specs=[
            pl.BlockSpec((1, Kp, n_seg), lambda i: (i, 0, 0)),       # clipwise
            pl.BlockSpec((Kp, lane_tile), lambda i: (0, i)),         # segmentwise
        ],
    )
    out_shapes = (
        jax.ShapeDtypeStruct((G, Kp, n_seg), jnp.float32),
        jax.ShapeDtypeStruct((Kp, Np), jnp.float32),
    )

    clip_p, cla_p = pl.pallas_call(
        kernel,
        out_shape=out_shapes,
        grid_spec=grid_spec,
        compiler_params=pltpu.CompilerParams(
            dimension_semantics=("parallel",),
            vmem_limit_bytes=vmem_limit),
    )(x, masks, w1_p, b1_p, w_ac, b_ac)

    clipwise = jnp.transpose(clip_p, (1, 0, 2)).reshape(Kp, Bp)[:K, :B].T
    segmentwise = cla_p.reshape(Kp, Bp, Tp)[:K, :B, :T].transpose(1, 2, 0)
    return clipwise, segmentwise                      # (B, K), (B, T, K)


# ---------------- JAX glue (matches the torch helper functions) ----------------

def interpolate_time(x, ratio):
    # x: (B, T, classes) -> (B, T*ratio, classes), nearest-style repetition
    return jnp.repeat(x, ratio, axis=1)


def pad_framewise_output(x, frames_num):
    # F.interpolate(..., mode='bilinear', align_corners=True) with unchanged
    # class axis reduces to 1-D linear interpolation along time.
    B, L, K = x.shape
    if frames_num == L:
        return x
    pos = jnp.arange(frames_num, dtype=jnp.float32) * (L - 1) / (frames_num - 1)
    lo = jnp.floor(pos).astype(jnp.int32)
    hi = jnp.minimum(lo + 1, L - 1)
    w = (pos - lo.astype(jnp.float32))[None, :, None]
    return x[:, lo, :] * (1.0 - w) + x[:, hi, :] * w


def sed_forward(feats, frames_num, params):
    clipwise_output, segmentwise_output = sed_head(
        feats,
        params["w1"], params["b1"],
        params["w_att"], params["b_att"],
        params["w_cla"], params["b_cla"],
    )
    logit = clipwise_output                   # activation='linear' => identical
    segmentwise_logit = segmentwise_output    # activation='linear' => identical

    T = segmentwise_output.shape[1]
    ratio = frames_num // T
    framewise_output = pad_framewise_output(
        interpolate_time(segmentwise_output, ratio), frames_num)
    framewise_logit = pad_framewise_output(
        interpolate_time(segmentwise_logit, ratio), frames_num)

    return {
        "framewise_output": framewise_output,
        "segmentwise_output": segmentwise_output,
        "segmentwise_logit": segmentwise_logit,
        "logit": logit,
        "framewise_logit": framewise_logit,
        "clipwise_output": clipwise_output,
    }


def make_params(key, in_features, classes):
    k1, k2, k3 = jax.random.split(key, 3)

    def xavier(k, fan_out, fan_in):
        limit = jnp.sqrt(6.0 / (fan_in + fan_out))
        return jax.random.uniform(k, (fan_out, fan_in), jnp.float32, -limit, limit)

    return {
        "w1": xavier(k1, in_features, in_features),
        "b1": jnp.zeros((in_features, 1), jnp.float32),
        "w_att": xavier(k2, classes, in_features),
        "b_att": jnp.zeros((classes, 1), jnp.float32),
        "w_cla": xavier(k3, classes, in_features),
        "b_cla": jnp.zeros((classes, 1), jnp.float32),
    }


if __name__ == "__main__":
    B, C, Fq, T = 2, 32, 4, 8       # batch, encoder channels, freq bins, time steps
    classes = 21
    frames_num = 70                 # original mel frames; ratio = 70 // 8 = 8

    key = jax.random.PRNGKey(0)
    k_feat, k_par = jax.random.split(key)
    feats = jax.random.normal(k_feat, (B, C, Fq, T), jnp.float32)
    params = make_params(k_par, C, classes)

    out = sed_forward(feats, frames_num, params)
    out = jax.tree_util.tree_map(jax.block_until_ready, out)

    assert out["clipwise_output"].shape == (B, classes)
    assert out["segmentwise_output"].shape == (B, T, classes)
    assert out["framewise_output"].shape == (B, frames_num, classes)
    assert bool(jnp.all(jnp.isfinite(out["framewise_output"])))
    assert bool(jnp.all(jnp.isfinite(out["clipwise_output"])))
    print("KERNEL_OK")
</pallas_src>

<mosaic_0001>
module attributes {stable_mosaic.version = 11 : i64} {
  func.func @sed_head_kernel(%arg0: i32, %arg1: memref<128x256xbf16, #tpu.memory_space<vmem>>, %arg2: memref<3x256xf32, #tpu.memory_space<vmem>>, %arg3: memref<128x128xbf16, #tpu.memory_space<vmem>>, %arg4: memref<128x1xf32, #tpu.memory_space<vmem>>, %arg5: memref<48x128xbf16, #tpu.memory_space<vmem>>, %arg6: memref<48x1xf32, #tpu.memory_space<vmem>>, %arg7: memref<1x24x2xf32, #tpu.memory_space<vmem>>, %arg8: memref<24x256xf32, #tpu.memory_space<vmem>>) attributes {dimension_semantics = [#tpu.dimension_semantics<parallel>], iteration_bounds = array<i64: 1>, scalar_prefetch = 0 : i64, scratch_operands = 0 : i64, tpu.core_type = #tpu.core_type<tc>, window_params = [{transform_indices = @transform_0, window_bounds = array<i64: 128, 256>}, {transform_indices = @transform_1, window_bounds = array<i64: 3, 256>}, {pipeline_mode = #tpu.pipeline_mode<synchronous>, transform_indices = @transform_2, window_bounds = array<i64: 128, 128>}, {pipeline_mode = #tpu.pipeline_mode<synchronous>, transform_indices = @transform_3, window_bounds = array<i64: 128, 1>}, {pipeline_mode = #tpu.pipeline_mode<synchronous>, transform_indices = @transform_4, window_bounds = array<i64: 48, 128>}, {pipeline_mode = #tpu.pipeline_mode<synchronous>, transform_indices = @transform_5, window_bounds = array<i64: 48, 1>}, {transform_indices = @transform_6, window_bounds = array<i64: 1, 24, 2>}, {transform_indices = @transform_7, window_bounds = array<i64: 24, 256>}]} {
    %c0 = arith.constant 0 : index
    %c0_0 = arith.constant 0 : index
    %0 = vector.load %arg1[%c0, %c0_0] : memref<128x256xbf16, #tpu.memory_space<vmem>>, vector<128x256xbf16>
    %1 = arith.extf %0 : vector<128x256xbf16> to vector<128x256xf32>
    %c0_1 = arith.constant 0 : index
    %c0_2 = arith.constant 0 : index
    %2 = vector.load %arg2[%c0_1, %c0_2] : memref<3x256xf32, #tpu.memory_space<vmem>>, vector<3x256xf32>
    %3 = vector.extract_strided_slice %2 {offsets = [0, 0], sizes = [1, 256], strides = [1, 1]} : vector<3x256xf32> to vector<1x256xf32>
    %4 = vector.extract_strided_slice %2 {offsets = [1, 0], sizes = [1, 256], strides = [1, 1]} : vector<3x256xf32> to vector<1x256xf32>
    %5 = vector.extract_strided_slice %2 {offsets = [2, 0], sizes = [1, 256], strides = [1, 1]} : vector<3x256xf32> to vector<1x256xf32>
    %c1_i32 = arith.constant 1 : i32
    %6 = tpu.dynamic_rotate %1 by %c1_i32 dim 1 : vector<128x256xf32>, i32 -> vector<128x256xf32>
    %cst = arith.constant 5.000000e-01 : f32
    %7 = vector.broadcast %cst : f32 to vector<1x256xf32>
    %8 = arith.cmpf ogt, %3, %7 : vector<1x256xf32>
    %cst_3 = arith.constant -1.000000e+30 : f32
    %9 = vector.shape_cast %8 : vector<1x256xi1> to vector<1x256xi1>
    %10 = vector.broadcast %9 : vector<1x256xi1> to vector<128x256xi1>
    %11 = vector.broadcast %cst_3 : f32 to vector<128x256xf32>
    %12 = arith.select %10, %6, %11 : vector<128x256xi1>, vector<128x256xf32>
    %13 = arith.maximumf %1, %12 : vector<128x256xf32>
    %14 = vector.broadcast %3 : vector<1x256xf32> to vector<128x256xf32>
    %15 = arith.mulf %6, %14 : vector<128x256xf32>
    %16 = arith.addf %1, %15 : vector<128x256xf32>
    %c255_i32 = arith.constant 255 : i32
    %17 = tpu.dynamic_rotate %1 by %c255_i32 dim 1 : vector<128x256xf32>, i32 -> vector<128x256xf32>
    %cst_4 = arith.constant 5.000000e-01 : f32
    %18 = vector.broadcast %cst_4 : f32 to vector<1x256xf32>
    %19 = arith.cmpf ogt, %4, %18 : vector<1x256xf32>
    %cst_5 = arith.constant -1.000000e+30 : f32
    %20 = vector.shape_cast %19 : vector<1x256xi1> to vector<1x256xi1>
    %21 = vector.broadcast %20 : vector<1x256xi1> to vector<128x256xi1>
    %22 = vector.broadcast %cst_5 : f32 to vector<128x256xf32>
    %23 = arith.select %21, %17, %22 : vector<128x256xi1>, vector<128x256xf32>
    %24 = arith.maximumf %13, %23 : vector<128x256xf32>
    %25 = vector.broadcast %4 : vector<1x256xf32> to vector<128x256xf32>
    %26 = arith.mulf %17, %25 : vector<128x256xf32>
    %27 = arith.addf %16, %26 : vector<128x256xf32>
    %cst_6 = arith.constant 0.333333343 : f32
    %28 = vector.broadcast %cst_6 : f32 to vector<128x256xf32>
    %29 = arith.mulf %27, %28 : vector<128x256xf32>
    %30 = arith.addf %24, %29 : vector<128x256xf32>
    %c0_7 = arith.constant 0 : index
    %c0_8 = arith.constant 0 : index
    %31 = vector.load %arg3[%c0_7, %c0_8] : memref<128x128xbf16, #tpu.memory_space<vmem>>, vector<128x128xbf16>
    %32 = arith.truncf %30 : vector<128x256xf32> to vector<128x256xbf16>
    %cst_9 = arith.constant dense<0.000000e+00> : vector<128x256xf32>
    %33 = tpu.matmul %31, %32, %cst_9 {dimension_numbers = #tpu.dot_dimension_numbers<[1], [0], [0], [1], [0, 0, 1, 1], [], []>} : vector<128x128xbf16>, vector<128x256xbf16>, vector<128x256xf32> -> vector<128x256xf32>
    %c0_10 = arith.constant 0 : index
    %c0_11 = arith.constant 0 : index
    %34 = vector.load %arg4[%c0_10, %c0_11] : memref<128x1xf32, #tpu.memory_space<vmem>>, vector<128x1xf32>
    %35 = vector.broadcast %34 : vector<128x1xf32> to vector<128x256xf32>
    %36 = arith.addf %33, %35 : vector<128x256xf32>
    %cst_12 = arith.constant 0.000000e+00 : f32
    %37 = vector.broadcast %cst_12 : f32 to vector<128x256xf32>
    %38 = arith.maximumf %36, %37 : vector<128x256xf32>
    %c0_13 = arith.constant 0 : index
    %c0_14 = arith.constant 0 : index
    %39 = vector.load %arg5[%c0_13, %c0_14] : memref<48x128xbf16, #tpu.memory_space<vmem>>, vector<48x128xbf16>
    %40 = arith.truncf %38 : vector<128x256xf32> to vector<128x256xbf16>
    %cst_15 = arith.constant dense<0.000000e+00> : vector<48x256xf32>
    %41 = tpu.matmul %39, %40, %cst_15 {dimension_numbers = #tpu.dot_dimension_numbers<[1], [0], [0], [1], [0, 0, 1, 1], [], []>} : vector<48x128xbf16>, vector<128x256xbf16>, vector<48x256xf32> -> vector<48x256xf32>
    %c0_16 = arith.constant 0 : index
    %c0_17 = arith.constant 0 : index
    %42 = vector.load %arg6[%c0_16, %c0_17] : memref<48x1xf32, #tpu.memory_space<vmem>>, vector<48x1xf32>
    %43 = vector.broadcast %42 : vector<48x1xf32> to vector<48x256xf32>
    %44 = arith.addf %41, %43 : vector<48x256xf32>
    %45 = vector.extract_strided_slice %44 {offsets = [0, 0], sizes = [24, 256], strides = [1, 1]} : vector<48x256xf32> to vector<24x256xf32>
    %46 = math.tanh %45 : vector<24x256xf32>
    %47 = vector.extract_strided_slice %44 {offsets = [24, 0], sizes = [24, 256], strides = [1, 1]} : vector<48x256xf32> to vector<24x256xf32>
    %c0_18 = arith.constant 0 : index
    %c0_19 = arith.constant 0 : index
    %48 = vector.load %arg8[%c0_18, %c0_19] : memref<24x256xf32, #tpu.memory_space<vmem>>, vector<24x256xf32>
    tpu.vector_store %arg8[%c0_18, %c0_19], %47 {strides = array<i32>} : memref<24x256xf32, #tpu.memory_space<vmem>>, vector<24x256xf32>,
    %49 = math.exp %46 : vector<24x256xf32>
    %50 = vector.broadcast %5 : vector<1x256xf32> to vector<24x256xf32>
    %51 = arith.mulf %49, %50 : vector<24x256xf32>
    %52 = vector.shape_cast %51 : vector<24x256xf32> to vector<24x2x128xf32>
    %cst_20 = arith.constant dense<0.000000e+00> : vector<24x2xf32>
    %53 = vector.multi_reduction <add>, %52, %cst_20 [2] : vector<24x2x128xf32> to vector<24x2xf32>
    %54 = arith.mulf %51, %47 : vector<24x256xf32>
    %55 = vector.shape_cast %54 : vector<24x256xf32> to vector<24x2x128xf32>
    %cst_21 = arith.constant dense<0.000000e+00> : vector<24x2xf32>
    %56 = vector.multi_reduction <add>, %55, %cst_21 [2] : vector<24x2x128xf32> to vector<24x2xf32>
    %cst_22 = arith.constant 1.000000e-30 : f32
    %57 = vector.broadcast %cst_22 : f32 to vector<24x2xf32>
    %58 = arith.maximumf %53, %57 : vector<24x2xf32>
    %59 = arith.divf %56, %58 : vector<24x2xf32>
    %c0_23 = arith.constant 0 : index
    %c0_24 = arith.constant 0 : index
    %c0_25 = arith.constant 0 : index
    %60 = vector.load %arg7[%c0_23, %c0_24, %c0_25] : memref<1x24x2xf32, #tpu.memory_space<vmem>>, vector<1x24x2xf32>
    %61 = vector.shape_cast %60 : vector<1x24x2xf32> to vector<24x2xf32>
    %62 = vector.shape_cast %59 : vector<24x2xf32> to vector<1x24x2xf32>
    tpu.vector_store %arg7[%c0_23, %c0_24, %c0_25], %62 {strides = array<i32>} : memref<1x24x2xf32, #tpu.memory_space<vmem>>, vector<1x24x2xf32>,
    return
  }
  func.func @transform_0(%arg0: i32) -> (i32, i32) {
    %c0_i32 = arith.constant 0 : i32
    %c0_i32_0 = arith.constant 0 : i32
    return %c0_i32, %arg0 : i32, i32
  }
  func.func @transform_1(%arg0: i32) -> (i32, i32) {
    %c0_i32 = arith.constant 0 : i32
    %c0_i32_0 = arith.constant 0 : i32
    return %c0_i32, %arg0 : i32, i32
  }
  func.func @transform_2(%arg0: i32) -> (i32, i32) {
    %c0_i32 = arith.constant 0 : i32
    %c0_i32_0 = arith.constant 0 : i32
    %c0_i32_1 = arith.constant 0 : i32
    return %c0_i32, %c0_i32_0 : i32, i32
  }
  func.func @transform_3(%arg0: i32) -> (i32, i32) {
    %c0_i32 = arith.constant 0 : i32
    %c0_i32_0 = arith.constant 0 : i32
    %c0_i32_1 = arith.constant 0 : i32
    return %c0_i32, %c0_i32_0 : i32, i32
  }
  func.func @transform_4(%arg0: i32) -> (i32, i32) {
    %c0_i32 = arith.constant 0 : i32
    %c0_i32_0 = arith.constant 0 : i32
    %c0_i32_1 = arith.constant 0 : i32
    return %c0_i32, %c0_i32_0 : i32, i32
  }
  func.func @transform_5(%arg0: i32) -> (i32, i32) {
    %c0_i32 = arith.constant 0 : i32
    %c0_i32_0 = arith.constant 0 : i32
    %c0_i32_1 = arith.constant 0 : i32
    return %c0_i32, %c0_i32_0 : i32, i32
  }
  func.func @transform_6(%arg0: i32) -> (i32, i32, i32) {
    %c0_i32 = arith.constant 0 : i32
    %c0_i32_0 = arith.constant 0 : i32
    %c0_i32_1 = arith.constant 0 : i32
    return %arg0, %c0_i32, %c0_i32_0 : i32, i32, i32
  }
  func.func @transform_7(%arg0: i32) -> (i32, i32) {
    %c0_i32 = arith.constant 0 : i32
    %c0_i32_0 = arith.constant 0 : i32
    return %c0_i32, %arg0 : i32, i32
  }
}

</mosaic_0001>

<bundles_post_ra>
// kernel: tpu_custom_call.1
= control target key start
LH: loop header
LB: loop body
LE: loop exit
PB: predicated region body
PF: predicated region fallthrough
CT: control target
= control target key end

     0   :  { %13 = vsyncpa [#allocation3], 0  ;;  %s3816_s0 = inlined_call_operand.vmem [shape: bf16[128,256], index: 0, kind: input, shape index: {}]   ;;  %s3817_s1 = inlined_call_operand.vmem [shape: f32[3,256], index: 1, kind: input, shape index: {}]   ;;  %s3818_s2 = inlined_call_operand.hbm [shape: bf16[128,128], index: 2, kind: input, shape index: {}]   ;;  %s3819_s3 = inlined_call_operand.vmem [shape: f32[128,1], index: 3, kind: input, shape index: {}]   ;;  %s3820_s4 = inlined_call_operand.vmem [shape: bf16[48,128], index: 4, kind: input, shape index: {}]   ;;  %s3821_s5 = inlined_call_operand.vmem [shape: f32[48,1], index: 5, kind: input, shape index: {}]   ;;  %s3822_s6 = inlined_call_operand.vmem [shape: f32[1,24,2], index: 6, kind: output, shape index: {0}]   ;;  %s3823_s7 = inlined_call_operand.hbm [shape: f32[24,256], index: 7, kind: output, shape index: {1}]  }
   0x1   :  { %14 = vsyncpa [#allocation4], 0  ;;  %s2301_s24 = smov [#allocation2]   ;;  %s2253_s28 = scalar_lea.hbm %s3818_s2, 1024 }
   0x2   :  { %s24_s25 = sshll.u32 %s2301_s24, 4  ;;  %p2254_p0 = scmp.ne.s32.totalorder %s3818_s2, %s2253_s28  ;;  %s25_s25 = int_to_ptr.vmem [resolvable:$true] %s24_s25 }
   0x3   :  { %p2257_p1 = scmp.lt.u32.totalorder %s2253_s28, %s3818_s2 }
   0x5   :  { %p2259_p2 = pnand %p2257_p1, %p2254_p0 }
   0x7   :  { %2262 = shalt.err (!%p2259_p2)
}
   0x8   :  { %s2263_s10 = scalar_lea.vmem %s25_s25, 1024  ;;  %p2268_p4 = scmp.lt.s32.totalorder %s25_s25, %s25_s25 }
   0x9   :  { %p2264_p3 = scmp.ne.s32.totalorder %s25_s25, %s2263_s10  ;;  %p2269_p5 = scmp.lt.s32.totalorder %s2263_s10, %s2263_s10 }
   0xb   :  { %p2270_p6 = por %p2269_p5, %p2268_p4 }
   0xd   :  { %p2271_p7 = pnand %p2270_p6, %p2264_p3 }
   0xf   :  { %2274 = shalt.err (!%p2271_p7)
}
  0x10   :  { %s2302_s11 = smov 64   ;;  %s2303_s12 = smov 4  }
  0x11   :  { %30 = dma.hbm_to_vmem [thread:$0]  %s3818_s2, 1024, %s25_s25, [#allocation3], %s2302_s11, %s2302_s11, %s2303_s12  }
  0x12   :  { %2297 = dma.done.wait [#allocation3], 1024  }
  0x13   :  { %2298 = vsyncadd [#allocation3], 4294966272  ;;  %v3824_v0 = vmov 0   ;;  %v41_v1 = vld [vmem:[%s3816_s0] sm:$0xff]  ;;  %v42_v2 = vld [vmem:[%s3816_s0 + $0x8] sm:$0xff]  ;;  %s2305_s22 = smov 127  }
  0x14   :  { %889 = vmatprep.mubr.bf16.mxu0 %v3824_v0  ;;  %2168 = vset.pattern.permute.xlu1 %v3824_v0  ;;  %v2375_v3 = vunpack.c.l.bf16 %v41_v1  ;;  %v2377_v4 = vunpack.c.h.bf16 %v41_v1  ;;  %v2379_v5 = vunpack.c.l.bf16 %v42_v2  ;;  %v2381_v6 = vunpack.c.h.bf16 %v42_v2  ;;  %v43_v7 = vld [vmem:[%s3816_s0 + $0x10] sm:$0xff]  ;;  %v44_v8 = vld [vmem:[%s3816_s0 + $0x18] sm:$0xff]  ;;  %s2306_s23 = smov 1   ;;  %v45_v15 = vld [vmem:[%s3816_s0 + $0x20] sm:$0xff] }
  0x15   :  { %2167 = vset.pattern.permute.xlu0 %v3824_v0  ;;  %1110 = vmatprep.mubr.bf16.mxu1 %v3824_v0  ;;  %v2391_v10 = vunpack.c.h.bf16 %v43_v7  ;;  %v2393_v11 = vunpack.c.h.bf16 %v44_v8  ;;  %v2399_v13 = vunpack.c.l.bf16 %v43_v7  ;;  %v2401_v14 = vunpack.c.l.bf16 %v44_v8  ;;  %v46_v16 = vld [vmem:[%s3816_s0 + $0x28] sm:$0xff]  ;;  %v47_v25 = vld [vmem:[%s3816_s0 + $0x30] sm:$0xff]  ;;  %v48_v26 = vld [vmem:[%s3816_s0 + $0x38] sm:$0xff] }
  0x16   :  { %v2017_v9 = vpack.i.bf16 %v2379_v5, %v2375_v3  ;;  %v2022_v12 = vpack.i.bf16 %v2381_v6, %v2377_v4  ;;  %v2417_v19 = vunpack.c.h.bf16 %v45_v15  ;;  %v2419_v20 = vunpack.c.h.bf16 %v46_v16  ;;  %v49_v33 = vld [vmem:[%s3816_s0 + $0x40] sm:$0xff]  ;;  %v50_v34 = vld [vmem:[%s3816_s0 + $0x48] sm:$0xff]  ;;  %v51_v41 = vld [vmem:[%s3816_s0 + $0x50] sm:$0xff] }
  0x17   :  { %3871 = vst [vmem:[#allocation8_spill] sm:$0xff] %v2401_v14  ;;  %v2032_v17 = vpack.i.bf16 %v2393_v11, %v2391_v10  ;;  %v2027_v18 = vpack.i.bf16 %v2401_v14, %v2399_v13  ;;  %v2421_v21 = vunpack.c.l.bf16 %v45_v15  ;;  %v2423_v22 = vunpack.c.l.bf16 %v46_v16  ;;  %v52_v42 = vld [vmem:[%s3816_s0 + $0x58] sm:$0xff]  ;;  %v53_v49 = vld [vmem:[%s3816_s0 + $0x60] sm:$0xff]  ;;  %v54_v50 = vld [vmem:[%s3816_s0 + $0x68] sm:$0xff] }
  0x18   :  { %2018 = vrot.lane.b32.xlu1 %v2017_v9, %s2305_s22  ;;  %2008 = vrot.lane.b32.xlu0 %v2017_v9, %s2306_s23  ;;  %v2052_v23 = vpack.i.bf16 %v2419_v20, %v2417_v19  ;;  %v2437_v27 = vunpack.c.h.bf16 %v47_v25  ;;  %v2439_v28 = vunpack.c.h.bf16 %v48_v26  ;;  %v2443_v29 = vunpack.c.l.bf16 %v47_v25  ;;  %v55_v57 = vld [vmem:[%s3816_s0 + $0x70] sm:$0xff]  ;;  %v56_v58 = vld [vmem:[%s3816_s0 + $0x78] sm:$0xff] }
  0x19   :  { %3872 = vst [vmem:[#allocation9_spill] sm:$0xff] %v2421_v21  ;;  %3873 = vst [vmem:[#allocation10_spill] sm:$0xff] %v2423_v22  ;;  %v2047_v24 = vpack.i.bf16 %v2423_v22, %v2421_v21  ;;  %v2445_v30 = vunpack.c.l.bf16 %v48_v26  ;;  %v2461_v35 = vunpack.c.h.bf16 %v49_v33  ;;  %v2463_v36 = vunpack.c.h.bf16 %v50_v34  ;;  %v89_v7 = vld [vmem:[%s3817_s1] sm:$0x77] }
  0x1a   :  { %v2072_v31 = vpack.i.bf16 %v2439_v28, %v2437_v27  ;;  %v2465_v37 = vunpack.c.l.bf16 %v49_v33  ;;  %v2467_v38 = vunpack.c.l.bf16 %v50_v34  ;;  %v2481_v43 = vunpack.c.h.bf16 %v51_v41 }
  0x1b   :  { %v2067_v32 = vpack.i.bf16 %v2445_v30, %v2443_v29  ;;  %3874 = vst [vmem:[#allocation11_spill] sm:$0xff] %v2461_v35  ;;  %3875 = vst [vmem:[#allocation12_spill] sm:$0xff] %v2463_v36  ;;  %v2092_v39 = vpack.i.bf16 %v2463_v36, %v2461_v35  ;;  %v2483_v44 = vunpack.c.h.bf16 %v52_v42  ;;  %v2487_v45 = vunpack.c.l.bf16 %v51_v41 }
  0x1c   :  { %2023 = vrot.lane.b32.xlu1 %v2022_v12, %s2305_s22  ;;  %2013 = vrot.lane.b32.xlu0 %v2022_v12, %s2306_s23  ;;  %3876 = vst [vmem:[#allocation13_spill] sm:$0xff] %v2465_v37  ;;  %3877 = vst [vmem:[#allocation14_spill] sm:$0xff] %v2467_v38  ;;  %v2087_v40 = vpack.i.bf16 %v2467_v38, %v2465_v37  ;;  %v2489_v46 = vunpack.c.l.bf16 %v52_v42  ;;  %v2505_v51 = vunpack.c.h.bf16 %v53_v49  ;;  %v2507_v52 = vunpack.c.h.bf16 %v54_v50 }
  0x1d   :  { %3878 = vst [vmem:[#allocation15_spill] sm:$0xff] %v2481_v43  ;;  %3879 = vst [vmem:[#allocation16_spill] sm:$0xff] %v2483_v44  ;;  %v2112_v47 = vpack.i.bf16 %v2483_v44, %v2481_v43  ;;  %v2509_v53 = vunpack.c.l.bf16 %v53_v49  ;;  %v2511_v54 = vunpack.c.l.bf16 %v54_v50  ;;  %v2525_v59 = vunpack.c.h.bf16 %v55_v57 }
  0x1e   :  { %3880 = vst [vmem:[#allocation17_spill] sm:$0xff] %v2487_v45  ;;  %3881 = vst [vmem:[#allocation18_spill] sm:$0xff] %v2489_v46  ;;  %v2107_v48 = vpack.i.bf16 %v2489_v46, %v2487_v45  ;;  %v2132_v55 = vpack.i.bf16 %v2507_v52, %v2505_v51  ;;  %v2527_v60 = vunpack.c.h.bf16 %v56_v58  ;;  %v2531_v61 = vunpack.c.l.bf16 %v55_v57 }
  0x1f   :  { %3882 = vst [vmem:[#allocation19_spill] sm:$0xff] %v2505_v51  ;;  %3883 = vst [vmem:[#allocation20_spill] sm:$0xff] %v2507_v52  ;;  %v2127_v56 = vpack.i.bf16 %v2511_v54, %v2509_v53  ;;  %v2533_v62 = vunpack.c.l.bf16 %v56_v58  ;;  %v154_v2 = vlaneseq  ;;  %vm189_vm0 = vcmp.gt.f32.partialorder %v89_v7, 0.5 }
  0x20   :  { %2033 = vrot.lane.b32.xlu1 %v2032_v17, %s2306_s23  ;;  %2028 = vrot.lane.b32.xlu0 %v2027_v18, %s2306_s23  ;;  %3884 = vst [vmem:[#allocation21_spill] sm:$0xff] %v2509_v53  ;;  %3885 = vst [vmem:[#allocation22_spill] sm:$0xff] %v2511_v54  ;;  %v2152_v63 = vpack.i.bf16 %v2527_v60, %v2525_v59  ;;  %v190_v12 = vsel %vm189_vm0, 1, %v3824_v0  ;;  %vm1387_vm7 = vcmask 1041408  }
  0x21   :  { %3886 = vst [vmem:[#allocation23_spill] sm:$0xff] %v2525_v59  ;;  %3887 = vst [vmem:[#allocation24_spill] sm:$0xff] %v2527_v60  ;;  %v2147_v1 = vpack.i.bf16 %v2533_v62, %v2531_v61  ;;  %v2548_v8 = vshrl.u32 %v154_v2, 7 }
  0x22   :  { %3888 = vst [vmem:[#allocation25_spill] sm:$0xff] %v2531_v61  ;;  %3889 = vst [vmem:[#allocation26_spill] sm:$0xff] %v2533_v62 }
  0x23   :  { %3890 = vst [vmem:[#allocation27_spill] sm:$0xff] %v2548_v8  ;;  %v197_v9 = vsub.s32 4, %v2548_v8  ;;  %v193_v15 = vsub.s32 0, %v2548_v8 }
  0x24   :  { %2043 = vrot.lane.b32.xlu1 %v2032_v17, %s2305_s22  ;;  %2038 = vrot.lane.b32.xlu0 %v2027_v18, %s2305_s22  ;;  %v455_v17 = vsub.s32 1, %v2548_v8  ;;  %v459_v18 = vsub.s32 5, %v2548_v8 }
  0x25   :  { %v198_v16 = vrot.slane %v190_v12, %v197_v9  ;;  %v277_v25 = vrot.slane %v89_v7, %v193_v15  ;;  %v281_v33 = vrot.slane %v89_v7, %v197_v9 }
  0x26   :  { %v538_v34 = vrot.slane %v89_v7, %v455_v17  ;;  %v456_v41 = vrot.slane %v190_v12, %v455_v17  ;;  %v460_v42 = vrot.slane %v190_v12, %v459_v18 }
  0x28   :  { %2053 = vrot.lane.b32.xlu1 %v2052_v23, %s2306_s23  ;;  %2048 = vrot.lane.b32.xlu0 %v2047_v24, %s2306_s23  ;;  %v2578_v9 = vrot.slane %v456_v41, %v455_v17 }
  0x2a   :  { %vm469_vm5 = vcmp.eq.s32.totalorder %v2578_v9, 1 }
  0x2c   :  { %2063 = vrot.lane.b32.xlu1 %v2052_v23, %s2305_s22  ;;  %2058 = vrot.lane.b32.xlu0 %v2047_v24, %s2305_s22  ;;  %v194_v23 = vrot.slane %v190_v12, %v193_v15  ;;  %v2555_v24 = vand.u32 127, %v154_v2  ;;  %v468_v12 = vrot.slane %v460_v42, %v455_v17 }
  0x2e   :  { %vm156_vm1 = vcmp.lt.s32.totalorder %v2555_v24, 1  ;;  %vm420_vm4 = vcmp.lt.s32.totalorder %v2555_v24, 127  ;;  %vm2620_vm6 = vcmp.eq.s32.totalorder %v468_v12, 1 }
  0x30   :  { %2073 = vrot.lane.b32.xlu1 %v2072_v31, %s2306_s23  ;;  %2068 = vrot.lane.b32.xlu0 %v2067_v32, %s2306_s23 }
  0x34   :  { %2083 = vrot.lane.b32.xlu1 %v2072_v31, %s2305_s22  ;;  %2078 = vrot.lane.b32.xlu0 %v2067_v32, %s2305_s22  ;;  %v206_v32 = vrot.slane %v198_v16, %v193_v15 }
  0x36   :  { %vm2566_vm2 = vcmp.eq.s32.totalorder %v206_v32, 1 }
  0x38   :  { %2093 = vrot.lane.b32.xlu1 %v2092_v39, %s2306_s23  ;;  %2088 = vrot.lane.b32.xlu0 %v2087_v40, %s2306_s23 }
  0x3c   :  { %2103 = vrot.lane.b32.xlu1 %v2092_v39, %s2305_s22  ;;  %2098 = vrot.lane.b32.xlu0 %v2087_v40, %s2305_s22  ;;  %v542_v39 = vrot.slane %v89_v7, %v459_v18  ;;  %v2559_v40 = vrot.slane %v194_v23, %v193_v15 }
  0x3e   :  { %v2574_v57 = vrot.slane %v542_v39, %v455_v17  ;;  %vm207_vm3 = vcmp.eq.s32.totalorder %v2559_v40, 1 }
  0x40   :  { %2113 = vrot.lane.b32.xlu1 %v2112_v47, %s2306_s23  ;;  %2108 = vrot.lane.b32.xlu0 %v2107_v48, %s2306_s23 }
  0x44   :  { %2123 = vrot.lane.b32.xlu1 %v2112_v47, %s2305_s22  ;;  %2118 = vrot.lane.b32.xlu0 %v2107_v48, %s2305_s22  ;;  %v2562_v47 = vrot.slane %v277_v25, %v193_v15 }
  0x48   :  { %2133 = vrot.lane.b32.xlu1 %v2132_v55, %s2306_s23  ;;  %2128 = vrot.lane.b32.xlu0 %v2127_v56, %s2306_s23 }
  0x4c   :  { %2143 = vrot.lane.b32.xlu1 %v2132_v55, %s2305_s22  ;;  %2138 = vrot.lane.b32.xlu0 %v2127_v56, %s2305_s22  ;;  %v2570_v55 = vrot.slane %v281_v33, %v193_v15  ;;  %v2572_v56 = vrot.slane %v538_v34, %v455_v17 }
  0x50   :  { %2153 = vrot.lane.b32.xlu1 %v2152_v63, %s2306_s23  ;;  %2148 = vrot.lane.b32.xlu0 %v2147_v1, %s2306_s23 }
  0x54   :  { %2163 = vrot.lane.b32.xlu1 %v2152_v63, %s2305_s22  ;;  %2158 = vrot.lane.b32.xlu0 %v2147_v1, %s2305_s22 }
  0x8a   :  { %v2557_v26 = vpop.permute.xlu1 %2018  ;;  %v2009_v31 = vpop.permute.xlu0 %2008 }
  0x8b   :  { %v2011_v58 = vunpack.i.h.bf16 %v2009_v31  ;;  %v2010_v63 = vunpack.i.l.bf16 %v2009_v31 }
  0x8e   :  { %v2564_v48 = vpop.permute.xlu1 %2023  ;;  %v2014_v49 = vpop.permute.xlu0 %2013 }
  0x8f   :  { %v2016_v1 = vunpack.i.h.bf16 %v2014_v49  ;;  %v2015_v2 = vunpack.i.l.bf16 %v2014_v49 }
  0x91   :  { %v2582_v16 = vsel %vm156_vm1, %v2015_v2, %v2010_v63  ;;  %v2586_v15 = vsel %vm156_vm1, %v2016_v1, %v2011_v58  ;;  %v157_v18 = vsel %vm156_vm1, %v2010_v63, %v2015_v2  ;;  %v158_v23 = vsel %vm156_vm1, %v2011_v58, %v2016_v1 }
  0x92   :  { %v2034_v32 = vpop.permute.xlu1 %2033  ;;  %v2029_v33 = vpop.permute.xlu0 %2028  ;;  %v210_v34 = vsel %vm2566_vm2, %v157_v18, -1e+30  ;;  %v2600_v58 = vmul.f32 %v2562_v47, %v2582_v16  ;;  %v2604_v63 = vmul.f32 %v2562_v47, %v2586_v15  ;;  %v212_v1 = vsel %vm2566_vm2, %v158_v23, -1e+30 }
  0x93   :  { %v2036_v39 = vunpack.i.h.bf16 %v2034_v32  ;;  %v2035_v41 = vunpack.i.l.bf16 %v2034_v32  ;;  %v2031_v42 = vunpack.i.h.bf16 %v2029_v33  ;;  %v2030_v49 = vunpack.i.l.bf16 %v2029_v33 }
  0x94   :  { %v2610_v2 = vmax.f32 %v2377_v4, %v210_v34  ;;  %v2637_v12 = vmax.f32 %v2381_v6, %v212_v1  ;;  %v295_v61 = vmul.f32 %v2570_v55, %v158_v23 }
  0x95   :  { %v160_v32 = vsel %vm156_vm1, %v2031_v42, %v2036_v39  ;;  %v176_v33 = vsel %vm156_vm1, %v2036_v39, %v2031_v42  ;;  %v159_v0 = vsel %vm156_vm1, %v2030_v49, %v2035_v41  ;;  %v175_v31 = vsel %vm156_vm1, %v2035_v41, %v2030_v49 }
  0x96   :  { %v2626_v34 = vsel %vm207_vm3, %v176_v33, -1e+30  ;;  %v216_v17 = vsel %vm2566_vm2, %v160_v32, -1e+30  ;;  %v298_v25 = vmul.f32 %v2562_v47, %v176_v33  ;;  %v299_v39 = vmul.f32 %v2570_v55, %v160_v32  ;;  %v2044_v42 = vpop.permute.xlu1 %2043  ;;  %v2039_v8 = vpop.permute.xlu0 %2038 }
  0x97   :  { %3895 = vst [vmem:[#allocation28_spill] sm:$0xff] %v2626_v34  ;;  %v2634_v41 = vsel %vm207_vm3, %v175_v31, -1e+30  ;;  %v293_v49 = vmul.f32 %v2570_v55, %v157_v18  ;;  %v2644_v33 = vmax.f32 %v2393_v11, %v216_v17  ;;  %v214_v60 = vsel %vm2566_vm2, %v159_v0, -1e+30 }
  0x98   :  { %v2647_v32 = vadd.f32 %v298_v25, %v2401_v14  ;;  %v296_v62 = vmul.f32 %v2562_v47, %v175_v31  ;;  %v297_v1 = vmul.f32 %v2570_v55, %v159_v0  ;;  %v2046_v51 = vunpack.i.h.bf16 %v2044_v42 }
  0x99   :  { %v2045_v18 = vunpack.i.l.bf16 %v2044_v42  ;;  %v2654_v23 = vadd.f32 %v299_v39, %v2393_v11  ;;  %v2041_v17 = vunpack.i.h.bf16 %v2039_v8  ;;  %v2040_v53 = vunpack.i.l.bf16 %v2039_v8 }
  0x9a   :  { %3896 = vst [vmem:[#allocation29_spill] sm:$0xff] %v2647_v32  ;;  %v2054_v52 = vpop.permute.xlu1 %2053  ;;  %v2049_v25 = vpop.permute.xlu0 %2048  ;;  %v2659_v54 = vmax.f32 %v2391_v10, %v214_v60  ;;  %v2662_v43 = vadd.f32 %v296_v62, %v2399_v13  ;;  %v2665_v0 = vadd.f32 %v293_v49, %v2377_v4  ;;  %v2668_v31 = vadd.f32 %v295_v61, %v2381_v6 }
  0x9b   :  { %v424_v11 = vsel %vm420_vm4, %v2041_v17, %v2046_v51  ;;  %v2674_v8 = vsel %vm420_vm4, %v2046_v51, %v2041_v17  ;;  %v423_v60 = vsel %vm420_vm4, %v2040_v53, %v2045_v18  ;;  %v2680_v62 = vsel %vm420_vm4, %v2045_v18, %v2040_v53 }
  0x9c   :  { %v2683_v4 = vadd.f32 %v297_v1, %v2391_v10  ;;  %v2687_v6 = vsel %vm469_vm5, %v424_v11, -1e+30  ;;  %v2056_v61 = vunpack.i.h.bf16 %v2054_v52  ;;  %v2055_v39 = vunpack.i.l.bf16 %v2054_v52 }
  0x9d   :  { %3897 = vst [vmem:[#allocation30_spill] sm:$0xff] %v2687_v6  ;;  %v2693_v42 = vmul.f32 %v2572_v56, %v424_v11  ;;  %v2697_v53 = vmul.f32 %v2574_v57, %v2674_v8  ;;  %v2701_v10 = vsel %vm469_vm5, %v423_v60, -1e+30  ;;  %v2707_v18 = vmul.f32 %v2572_v56, %v423_v60 }
  0x9e   :  { %v2064_v49 = vpop.permute.xlu1 %2063  ;;  %v2059_v1 = vpop.permute.xlu0 %2058  ;;  %v2051_v17 = vunpack.i.h.bf16 %v2049_v25  ;;  %v2050_v11 = vunpack.i.l.bf16 %v2049_v25  ;;  %v2711_v59 = vmul.f32 %v2574_v57, %v2680_v62  ;;  %v3904_v6 = vunpack.i.h.bf16 %v2557_v26 }
  0x9f   :  { %3898 = vst [vmem:[#allocation31_spill] sm:$0xff] %v2693_v42  ;;  %v2066_v51 = vunpack.i.h.bf16 %v2064_v49  ;;  %v2065_v45 = vunpack.i.l.bf16 %v2064_v49  ;;  %v2061_v44 = vunpack.i.h.bf16 %v2059_v1  ;;  %v2060_v38 = vunpack.i.l.bf16 %v2059_v1 }
  0xa0   :  { %v162_v46 = vsel %vm156_vm1, %v2051_v17, %v2056_v61  ;;  %v178_v35 = vsel %vm156_vm1, %v2056_v61, %v2051_v17  ;;  %v161_v52 = vsel %vm156_vm1, %v2050_v11, %v2055_v39  ;;  %v177_v60 = vsel %vm156_vm1, %v2055_v39, %v2050_v11 }
  0xa1   :  { %v2723_v25 = vsel %vm207_vm3, %v178_v35, -1e+30  ;;  %v220_v49 = vsel %vm2566_vm2, %v162_v46, -1e+30  ;;  %v302_v37 = vmul.f32 %v2562_v47, %v178_v35  ;;  %v303_v36 = vmul.f32 %v2570_v55, %v162_v46 }
  0xa2   :  { %3899 = vst [vmem:[#allocation32_spill] sm:$0xff] %v2723_v25  ;;  %v2731_v61 = vsel %vm207_vm3, %v177_v60, -1e+30  ;;  %v218_v17 = vsel %vm2566_vm2, %v161_v52, -1e+30  ;;  %v3901_v39 = vunpack.i.l.bf16 %v2557_v26  ;;  %v3902_v11 = vunpack.i.l.bf16 %v2564_v48 }
  0xa3   :  { %3900 = vst [vmem:[#allocation33_spill] sm:$0xff] %v2731_v61  ;;  %v2744_v46 = vmax.f32 %v2419_v20, %v220_v49  ;;  %v2747_v14 = vadd.f32 %v302_v37, %v2423_v22  ;;  %v3905_v1 = vunpack.i.h.bf16 %v2564_v48  ;;  %v300_v32 = vmul.f32 %v2562_v47, %v177_v60  ;;  %v2074_v61 = vpop.permute.xlu1 %2073 }
  0xa4   :  { %v437_v34 = vsel %vm420_vm4, %v3902_v11, %v3901_v39  ;;  %v301_v39 = vmul.f32 %v2570_v55, %v161_v52  ;;  %v426_v11 = vsel %vm420_vm4, %v2061_v44, %v2066_v51  ;;  %v2761_v49 = vsel %vm420_vm4, %v2066_v51, %v2061_v44 }
  0xa5   :  { %3903 = vst [vmem:[#allocation34_spill] sm:$0xff] %v2747_v14  ;;  %v438_v42 = vsel %vm420_vm4, %v3905_v1, %v3904_v6  ;;  %v2764_v37 = vadd.f32 %v303_v36, %v2419_v20  ;;  %v2769_v25 = vmax.f32 %v2417_v19, %v218_v17  ;;  %v2773_v6 = vsel %vm469_vm5, %v426_v11, -1e+30 }
  0xa6   :  { %3906 = vst [vmem:[#allocation35_spill] sm:$0xff] %v2773_v6  ;;  %v2779_v44 = vmul.f32 %v2572_v56, %v426_v11  ;;  %v425_v20 = vsel %vm420_vm4, %v2060_v38, %v2065_v45  ;;  %v2785_v36 = vsel %vm420_vm4, %v2065_v45, %v2060_v38  ;;  %v2788_v51 = vadd.f32 %v300_v32, %v2421_v21 }
  0xa7   :  { %v2791_v60 = vadd.f32 %v301_v39, %v2417_v19  ;;  %v2795_v17 = vmul.f32 %v2574_v57, %v2761_v49  ;;  %v2799_v1 = vsel %vm469_vm5, %v425_v20, -1e+30  ;;  %v472_v38 = vsel %vm2620_vm6, %v437_v34, -1e+30 }
  0xa8   :  { %3907 = vst [vmem:[#allocation36_spill] sm:$0xff] %v2779_v44  ;;  %3908 = vst [vmem:[#allocation37_spill] sm:$0xff] %v2799_v1  ;;  %v554_v45 = vmul.f32 %v2574_v57, %v437_v34  ;;  %v556_v19 = vmul.f32 %v2574_v57, %v438_v42  ;;  %v474_v32 = vsel %vm2620_vm6, %v438_v42, -1e+30  ;;  %v504_v39 = vmax.f32 %v2610_v2, %v472_v38 }
  0xa9   :  { %v209_v35 = vsel %vm207_vm3, %v2582_v16, -1e+30  ;;  %v211_v52 = vsel %vm207_vm3, %v2586_v15, -1e+30  ;;  %v506_v11 = vmax.f32 %v2637_v12, %v474_v32  ;;  %v324_v2 = vadd.f32 %v2600_v58, %v2375_v3 }
  0xaa   :  { %v586_v22 = vadd.f32 %v554_v45, %v2665_v0  ;;  %v588_v34 = vadd.f32 %v556_v19, %v2668_v31  ;;  %v241_v6 = vmax.f32 %v2375_v3, %v209_v35  ;;  %v326_v42 = vadd.f32 %v2604_v63, %v2379_v5  ;;  %v2069_v63 = vpop.permute.xlu0 %2068 }
  0xab   :  { %v3909_v16 = vunpack.i.l.bf16 %v2564_v48  ;;  %v3910_v38 = vunpack.i.l.bf16 %v2557_v26  ;;  %v3911_v12 = vunpack.i.h.bf16 %v2564_v48  ;;  %v3912_v0 = vunpack.i.h.bf16 %v2557_v26 }
  0xac   :  { %v618_v35 = vmul.f32 0.33333334, %v586_v22  ;;  %v620_v45 = vmul.f32 0.33333334, %v588_v34  ;;  %v243_v3 = vmax.f32 %v2379_v5, %v211_v52  ;;  %v2840_v19 = vmul.f32 %v2572_v56, %v425_v20 }
  0xad   :  { %v421_v15 = vsel %vm420_vm4, %v3910_v38, %v3909_v16  ;;  %v422_v31 = vsel %vm420_vm4, %v3912_v0, %v3911_v12  ;;  %v2076_v16 = vunpack.i.h.bf16 %v2074_v61  ;;  %v2075_v5 = vunpack.i.l.bf16 %v2074_v61 }
  0xae   :  { %v553_v58 = vmul.f32 %v2572_v56, %v421_v15  ;;  %v471_v32 = vsel %vm469_vm5, %v421_v15, -1e+30  ;;  %v555_v48 = vmul.f32 %v2572_v56, %v422_v31  ;;  %v650_v26 = vadd.f32 %v618_v35, %v504_v39 }
  0xaf   :  { %v652_v38 = vadd.f32 %v620_v45, %v506_v11  ;;  %v473_v22 = vsel %vm469_vm5, %v422_v31, -1e+30  ;;  %v2071_v52 = vunpack.i.h.bf16 %v2069_v63  ;;  %v2070_v0 = vunpack.i.l.bf16 %v2069_v63 }
  0xb0   :  { %v585_v34 = vadd.f32 %v553_v58, %v324_v2  ;;  %v587_v12 = vadd.f32 %v555_v48, %v326_v42  ;;  %v503_v1 = vmax.f32 %v241_v6, %v471_v32  ;;  %v505_v20 = vmax.f32 %v243_v3, %v473_v22  ;;  %v3935_v3 = vld [vmem:[#allocation35_spill] sm:$0xff] }
  0xb1   :  { %v698_v21 = vpack.c.bf16 %v652_v38, %v650_v26  ;;  %v164_v15 = vsel %vm156_vm1, %v2071_v52, %v2076_v16  ;;  %v180_v39 = vsel %vm156_vm1, %v2076_v16, %v2071_v52  ;;  %v163_v11 = vsel %vm156_vm1, %v2070_v0, %v2075_v5  ;;  %v2079_v26 = vpop.permute.xlu0 %2078 }
  0xb2   :  { %v617_v44 = vmul.f32 0.33333334, %v585_v34  ;;  %v619_v14 = vmul.f32 0.33333334, %v587_v12  ;;  %v2855_v61 = vsel %vm207_vm3, %v180_v39, -1e+30  ;;  %v306_v42 = vmul.f32 %v2562_v47, %v180_v39 }
  0xb3   :  { %857 = vmatprep.subr.bf16.mxu0 %v698_v21  ;;  %v224_v6 = vsel %vm2566_vm2, %v164_v15, -1e+30  ;;  %v562_v31 = vmul.f32 %v2574_v57, %v2785_v36  ;;  %v307_v45 = vmul.f32 %v2570_v55, %v164_v15  ;;  %v3913_v21 = vsel %vm2620_vm6, %v2680_v62, -1e+30  ;;  %v3916_v15 = vld [vmem:[#allocation29_spill] sm:$0xff]  ;;  %v3936_v34 = vld [vmem:[#allocation10_spill] sm:$0xff] }
  0xb4   :  { %v649_v2 = vadd.f32 %v617_v44, %v503_v1  ;;  %v651_v35 = vadd.f32 %v619_v14, %v505_v20  ;;  %v508_v44 = vmax.f32 %v2659_v54, %v3913_v21  ;;  %v2084_v1 = vpop.permute.xlu1 %2083  ;;  %v179_v58 = vsel %vm156_vm1, %v2075_v5, %v2070_v0  ;;  %v3920_v21 = vld [vmem:[#allocation28_spill] sm:$0xff] }
  0xb5   :  { %v222_v63 = vsel %vm2566_vm2, %v163_v11, -1e+30  ;;  %v3914_v14 = vsel %vm2620_vm6, %v2674_v8, -1e+30  ;;  %v2880_v62 = vmax.f32 %v2439_v28, %v224_v6  ;;  %v2883_v54 = vadd.f32 %v306_v42, %v2445_v30 }
  0xb6   :  { %v510_v32 = vmax.f32 %v2644_v33, %v3914_v14  ;;  %v697_v48 = vpack.c.bf16 %v651_v35, %v649_v2  ;;  %v2887_v16 = vsel %vm207_vm3, %v179_v58, -1e+30  ;;  %v2890_v38 = vadd.f32 %v307_v45, %v2439_v28 }
  0xb7   :  { %v2893_v22 = vmax.f32 %v2437_v27, %v222_v63  ;;  %v305_v33 = vmul.f32 %v2570_v55, %v163_v11  ;;  %v590_v8 = vadd.f32 %v2711_v59, %v2683_v4  ;;  %v304_v12 = vmul.f32 %v2562_v47, %v179_v58  ;;  %v3917_v59 = vld [vmem:[#allocation31_spill] sm:$0xff] }
  0xb8   :  { %858 = vmatpush1.bf16.msra.mxu0 %v697_v48  ;;  %v592_v5 = vadd.f32 %v2697_v53, %v2654_v23  ;;  %v589_v28 = vadd.f32 %v2707_v18, %v2662_v43  ;;  %v3915_v0 = vmax.f32 %v2399_v13, %v2634_v41  ;;  %v591_v4 = vadd.f32 %v3917_v59, %v3916_v15  ;;  %v2094_v35 = vpop.permute.xlu1 %2093  ;;  %v3918_v23 = vld [vmem:[#allocation30_spill] sm:$0xff]  ;;  %v3919_v53 = vld [vmem:[#allocation8_spill] sm:$0xff] }
  0xb9   :  { %v622_v52 = vmul.f32 0.33333334, %v590_v8  ;;  %v2086_v39 = vunpack.i.h.bf16 %v2084_v1  ;;  %v2085_v6 = vunpack.i.l.bf16 %v2084_v1  ;;  %v2081_v42 = vunpack.i.h.bf16 %v2079_v26  ;;  %v2089_v1 = vpop.permute.xlu0 %2088 }
  0xba   :  { %v507_v20 = vmax.f32 %v3915_v0, %v2701_v10  ;;  %v624_v11 = vmul.f32 0.33333334, %v592_v5  ;;  %v621_v2 = vmul.f32 0.33333334, %v589_v28  ;;  %v3921_v43 = vmax.f32 %v3919_v53, %v3920_v21 }
  0xbb   :  { %v654_v45 = vadd.f32 %v622_v52, %v508_v44  ;;  %v623_v58 = vmul.f32 0.33333334, %v591_v4  ;;  %v2080_v63 = vunpack.i.l.bf16 %v2079_v26  ;;  %v428_v41 = vsel %vm420_vm4, %v2081_v42, %v2086_v39 }
  0xbc   :  { %v509_v18 = vmax.f32 %v3921_v43, %v3918_v23  ;;  %v656_v14 = vadd.f32 %v624_v11, %v510_v32  ;;  %v653_v13 = vadd.f32 %v621_v2, %v507_v20  ;;  %v2919_v10 = vsel %vm420_vm4, %v2086_v39, %v2081_v42  ;;  %v2104_v53 = vpop.permute.xlu1 %2103  ;;  %v714_v43 = vld [vmem:[%s3819_s3 + $0x8] sm:$0xff] }
  0xbd   :  { %v2922_v48 = vadd.f32 %v304_v12, %v2443_v29  ;;  %v2925_v44 = vadd.f32 %v305_v33, %v2437_v27  ;;  %v2096_v5 = vunpack.i.h.bf16 %v2094_v35  ;;  %v2929_v32 = vsel %vm469_vm5, %v428_v41, -1e+30  ;;  %v2099_v21 = vpop.permute.xlu0 %2098  ;;  %736 = vperm.xlu1 %2168, %v714_v43   ;;  %v3929_v43 = vld [vmem:[#allocation34_spill] sm:$0xff]  ;;  %v3937_v27 = vld [vmem:[#allocation32_spill] sm:$0xff] }
  0xbe   :  { %v655_v8 = vadd.f32 %v623_v58, %v509_v18  ;;  %v700_v28 = vpack.c.bf16 %v656_v14, %v654_v45  ;;  %v427_v26 = vsel %vm420_vm4, %v2080_v63, %v2085_v6  ;;  %v2935_v52 = vsel %vm420_vm4, %v2085_v6, %v2080_v63  ;;  %v713_v18 = vld [vmem:[%s3819_s3] sm:$0xff] }
  0xbf   :  { %v2941_v33 = vmul.f32 %v2572_v56, %v428_v41  ;;  %v2945_v12 = vmul.f32 %v2574_v57, %v2919_v10  ;;  %v2949_v20 = vsel %vm469_vm5, %v427_v26, -1e+30  ;;  %v2095_v15 = vunpack.i.l.bf16 %v2094_v35  ;;  %731 = vperm.xlu0 %2167, %v713_v18   ;;  %v3930_v18 = vld [vmem:[#allocation36_spill] sm:$0xff] }
  0xc0   :  { %v699_v0 = vpack.c.bf16 %v655_v8, %v653_v13  ;;  %859 = vmatprep.subr.bf16.mxu0 %v700_v28  ;;  %v2091_v59 = vunpack.i.h.bf16 %v2089_v1  ;;  %v2090_v4 = vunpack.i.l.bf16 %v2089_v1  ;;  %v2955_v11 = vmul.f32 %v2572_v56, %v427_v26  ;;  %v3926_v8 = vld [vmem:[#allocation14_spill] sm:$0xff]  ;;  %v3927_v28 = vld [vmem:[#allocation12_spill] sm:$0xff] }
  0xc1   :  { %v594_v2 = vadd.f32 %v562_v31, %v2791_v60  ;;  %v596_v6 = vadd.f32 %v2795_v17, %v2764_v37  ;;  %v2984_v58 = vmul.f32 %v2574_v57, %v2935_v52  ;;  %v3924_v14 = vsel %vm2620_vm6, %v2785_v36, -1e+30  ;;  %v3928_v36 = vld [vmem:[#allocation13_spill] sm:$0xff] }
  0xc2   :  { %860 = vmatpush1.bf16.msra.mxu0 %v699_v0  ;;  %v166_v42 = vsel %vm156_vm1, %v2091_v59, %v2096_v5  ;;  %v182_v35 = vsel %vm156_vm1, %v2096_v5, %v2091_v59  ;;  %v165_v45 = vsel %vm156_vm1, %v2090_v4, %v2095_v15  ;;  %v181_v23 = vsel %vm156_vm1, %v2095_v15, %v2090_v4  ;;  %v3932_v5 = vld [vmem:[#allocation9_spill] sm:$0xff] }
  0xc3   :  { %v2970_v60 = vsel %vm207_vm3, %v182_v35, -1e+30  ;;  %v228_v37 = vsel %vm2566_vm2, %v166_v42, -1e+30  ;;  %v310_v17 = vmul.f32 %v2562_v47, %v182_v35  ;;  %v311_v31 = vmul.f32 %v2570_v55, %v166_v42  ;;  %v716_v42 = vld [vmem:[%s3819_s3 + $0x18] sm:$0xff] }
  0xc4   :  { %3922 = vst [vmem:[#allocation29_spill] sm:$0xff] %v2970_v60  ;;  %v2988_v63 = vsel %vm207_vm3, %v181_v23, -1e+30  ;;  %v512_v13 = vmax.f32 %v2769_v25, %v3924_v14  ;;  %v3925_v41 = vsel %vm2620_vm6, %v2761_v49, -1e+30  ;;  %v3003_v26 = vmax.f32 %v3927_v28, %v228_v37  ;;  %v715_v49 = vld [vmem:[%s3819_s3 + $0x10] sm:$0xff]  ;;  %v2114_v60 = vpop.permute.xlu1 %2113  ;;  %746 = vperm.xlu0 %2167, %v716_v42  }
  0xc5   :  { %3923 = vst [vmem:[#allocation31_spill] sm:$0xff] %v2988_v63  ;;  %v514_v1 = vmax.f32 %v2744_v46, %v3925_v41  ;;  %v3006_v0 = vadd.f32 %v310_v17, %v3926_v8  ;;  %v226_v25 = vsel %vm2566_vm2, %v165_v45, -1e+30  ;;  %v3014_v46 = vadd.f32 %v311_v31, %v3927_v28  ;;  %v3931_v28 = vld [vmem:[#allocation37_spill] sm:$0xff]  ;;  %741 = vperm.xlu1 %2168, %v715_v49  }
  0xc6   :  { %v626_v59 = vmul.f32 0.33333334, %v594_v2  ;;  %v628_v4 = vmul.f32 0.33333334, %v596_v6  ;;  %v308_v35 = vmul.f32 %v2562_v47, %v181_v23  ;;  %v309_v37 = vmul.f32 %v2570_v55, %v165_v45  ;;  %v3933_v2 = vld [vmem:[#allocation33_spill] sm:$0xff]  ;;  %v2109_v45 = vpop.permute.xlu0 %2108 }
  0xc7   :  { %v593_v17 = vadd.f32 %v2840_v19, %v2788_v51  ;;  %v595_v31 = vadd.f32 %v3930_v18, %v3929_v43  ;;  %v3934_v6 = vmax.f32 %v3932_v5, %v3933_v2  ;;  %v3938_v39 = vmax.f32 %v3936_v34, %v3937_v27  ;;  %v717_v43 = vld [vmem:[%s3819_s3 + $0x20] sm:$0xff] }
  0xc8   :  { %v658_v14 = vadd.f32 %v626_v59, %v512_v13  ;;  %v660_v41 = vadd.f32 %v628_v4, %v514_v1  ;;  %v2106_v19 = vunpack.i.h.bf16 %v2104_v53  ;;  %v2105_v63 = vunpack.i.l.bf16 %v2104_v53  ;;  %v3939_v13 = vld [vmem:[#allocation11_spill] sm:$0xff] }
  0xc9   :  { %v511_v15 = vmax.f32 %v3934_v6, %v3931_v28  ;;  %v513_v23 = vmax.f32 %v3938_v39, %v3935_v3  ;;  %v625_v8 = vmul.f32 0.33333334, %v593_v17  ;;  %v627_v51 = vmul.f32 0.33333334, %v595_v31  ;;  %v718_v3 = vld [vmem:[%s3819_s3 + $0x28] sm:$0xff]  ;;  %751 = vperm.xlu1 %2168, %v717_v43   ;;  %v720_v6 = vld [vmem:[%s3819_s3 + $0x38] sm:$0xff] }
  0xca   :  { %v3036_v1 = vmax.f32 %v3939_v13, %v226_v25  ;;  %v702_v59 = vpack.c.bf16 %v660_v41, %v658_v14  ;;  %v2101_v4 = vunpack.i.h.bf16 %v2099_v21  ;;  %v2100_v5 = vunpack.i.l.bf16 %v2099_v21  ;;  %756 = vperm.xlu0 %2167, %v718_v3   ;;  %v3940_v3 = vld [vmem:[#allocation18_spill] sm:$0xff] }
  0xcb   :  { %v657_v34 = vadd.f32 %v625_v8, %v511_v15  ;;  %v659_v27 = vadd.f32 %v627_v51, %v513_v23  ;;  %v2116_v39 = vunpack.i.h.bf16 %v2114_v60  ;;  %v2111_v49 = vunpack.i.h.bf16 %v2109_v45 }
  0xcc   :  { %v3045_v53 = vadd.f32 %v308_v35, %v3928_v36  ;;  %861 = vmatprep.subr.bf16.mxu0 %v702_v59  ;;  %v430_v25 = vsel %vm420_vm4, %v2101_v4, %v2106_v19  ;;  %v3051_v21 = vsel %vm420_vm4, %v2106_v19, %v2101_v4  ;;  %v429_v42 = vsel %vm420_vm4, %v2100_v5, %v2105_v63 }
  0xcd   :  { %v3056_v17 = vadd.f32 %v309_v37, %v3939_v13  ;;  %v701_v8 = vpack.c.bf16 %v659_v27, %v657_v34  ;;  %v3060_v15 = vsel %vm420_vm4, %v2105_v63, %v2100_v5  ;;  %v2115_v35 = vunpack.i.l.bf16 %v2114_v60  ;;  %v719_v60 = vld [vmem:[%s3819_s3 + $0x30] sm:$0xff] }
  0xce   :  { %v3064_v18 = vsel %vm469_vm5, %v430_v25, -1e+30  ;;  %v3070_v14 = vmul.f32 %v2572_v56, %v430_v25  ;;  %v3074_v37 = vmul.f32 %v2574_v57, %v3051_v21  ;;  %v3081_v63 = vsel %vm469_vm5, %v429_v42, -1e+30  ;;  %761 = vperm.xlu1 %2168, %v719_v60   ;;  %v3941_v27 = vld [vmem:[#allocation16_spill] sm:$0xff]  ;;  %766 = vperm.xlu0 %2167, %v720_v6   ;;  %v721_v25 = vld [vmem:[%s3819_s3 + $0x40] sm:$0xff] }
  0xcf   :  { %862 = vmatpush1.bf16.msra.mxu0 %v701_v8  ;;  %v168_v41 = vsel %vm156_vm1, %v2111_v49, %v2116_v39  ;;  %v184_v28 = vsel %vm156_vm1, %v2116_v39, %v2111_v49  ;;  %v2110_v2 = vunpack.i.l.bf16 %v2109_v45  ;;  %v488_v59 = vsel %vm2620_vm6, %v3060_v15, -1e+30  ;;  %v3942_v60 = vld [vmem:[#allocation17_spill] sm:$0xff]  ;;  %v722_v6 = vld [vmem:[%s3819_s3 + $0x48] sm:$0xff] }
  0xd0   :  { %v3092_v23 = vsel %vm207_vm3, %v184_v28, -1e+30  ;;  %v232_v51 = vsel %vm2566_vm2, %v168_v41, -1e+30  ;;  %v314_v19 = vmul.f32 %v2562_v47, %v184_v28  ;;  %v315_v13 = vmul.f32 %v2570_v55, %v168_v41  ;;  %v2124_v28 = vpop.permute.xlu1 %2123 }
  0xd1   :  { %v3102_v45 = vmul.f32 %v2572_v56, %v429_v42  ;;  %v167_v4 = vsel %vm156_vm1, %v2110_v2, %v2115_v35  ;;  %v183_v5 = vsel %vm156_vm1, %v2115_v35, %v2110_v2  ;;  %v3110_v43 = vmul.f32 %v2574_v57, %v3060_v15  ;;  %v2119_v2 = vpop.permute.xlu0 %2118 }
  0xd2   :  { %v3115_v39 = vmax.f32 %v3941_v27, %v232_v51  ;;  %v3119_v49 = vsel %vm207_vm3, %v183_v5, -1e+30  ;;  %v3125_v42 = vadd.f32 %v314_v19, %v3940_v3  ;;  %v3128_v8 = vadd.f32 %v315_v13, %v3941_v27  ;;  %771 = vperm.xlu1 %2168, %v721_v25   ;;  %776 = vperm.xlu0 %2167, %v722_v6  }
  0xd3   :  { %v230_v35 = vsel %vm2566_vm2, %v167_v4, -1e+30  ;;  %v312_v51 = vmul.f32 %v2562_v47, %v183_v5  ;;  %v313_v19 = vmul.f32 %v2570_v55, %v167_v4  ;;  %v598_v13 = vadd.f32 %v2984_v58, %v2925_v44 }
  0xd4   :  { %v600_v27 = vadd.f32 %v2945_v12, %v2890_v38  ;;  %v3943_v34 = vsel %vm2620_vm6, %v2935_v52, -1e+30  ;;  %v3944_v31 = vsel %vm2620_vm6, %v2919_v10, -1e+30  ;;  %v3945_v4 = vmax.f32 %v2443_v29, %v2887_v16  ;;  %v723_v29 = vld [vmem:[%s3819_s3 + $0x50] sm:$0xff] }
  0xd5   :  { %v516_v41 = vmax.f32 %v2893_v22, %v3943_v34  ;;  %v518_v5 = vmax.f32 %v2880_v62, %v3944_v31  ;;  %v3946_v38 = vmax.f32 %v2445_v30, %v2855_v61  ;;  %v630_v52 = vmul.f32 0.33333334, %v598_v13  ;;  %v724_v30 = vld [vmem:[%s3819_s3 + $0x58] sm:$0xff]  ;;  %v2129_v6 = vpop.permute.xlu0 %2128 }
  0xd6   :  { %v515_v44 = vmax.f32 %v3945_v4, %v2949_v20  ;;  %v632_v58 = vmul.f32 0.33333334, %v600_v27  ;;  %v597_v22 = vadd.f32 %v2955_v11, %v2922_v48  ;;  %v599_v10 = vadd.f32 %v2941_v33, %v2883_v54  ;;  %v3947_v11 = vld [vmem:[#allocation15_spill] sm:$0xff]  ;;  %781 = vperm.xlu1 %2168, %v723_v29   ;;  %786 = vperm.xlu0 %2167, %v724_v30  }
  0xd7   :  { %v517_v12 = vmax.f32 %v3946_v38, %v2929_v32  ;;  %v2126_v62 = vunpack.i.h.bf16 %v2124_v28  ;;  %v2125_v16 = vunpack.i.l.bf16 %v2124_v28  ;;  %v2121_v20 = vunpack.i.h.bf16 %v2119_v2 }
  0xd8   :  { %v2120_v31 = vunpack.i.l.bf16 %v2119_v2  ;;  %v662_v61 = vadd.f32 %v630_v52, %v516_v41  ;;  %v664_v32 = vadd.f32 %v632_v58, %v518_v5  ;;  %v629_v34 = vmul.f32 0.33333334, %v597_v22  ;;  %v2134_v2 = vpop.permute.xlu1 %2133  ;;  %v725_v5 = vld [vmem:[%s3819_s3 + $0x60] sm:$0xff]  ;;  %v726_v22 = vld [vmem:[%s3819_s3 + $0x68] sm:$0xff] }
  0xd9   :  { %v631_v48 = vmul.f32 0.33333334, %v599_v10  ;;  %v3172_v25 = vmax.f32 %v3947_v11, %v230_v35  ;;  %v432_v54 = vsel %vm420_vm4, %v2121_v20, %v2126_v62  ;;  %v3178_v33 = vsel %vm420_vm4, %v2126_v62, %v2121_v20 }
  0xda   :  { %v431_v28 = vsel %vm420_vm4, %v2120_v31, %v2125_v16  ;;  %v3183_v41 = vadd.f32 %v312_v51, %v3942_v60  ;;  %v704_v13 = vpack.c.bf16 %v664_v32, %v662_v61  ;;  %v661_v27 = vadd.f32 %v629_v34, %v515_v44  ;;  %791 = vperm.xlu1 %2168, %v725_v5   ;;  %v727_v32 = vld [vmem:[%s3819_s3 + $0x70] sm:$0xff] }
  0xdb   :  { %v663_v35 = vadd.f32 %v631_v48, %v517_v12  ;;  %v3189_v4 = vadd.f32 %v313_v19, %v3947_v11  ;;  %v3193_v38 = vsel %vm469_vm5, %v432_v54, -1e+30  ;;  %v3200_v44 = vsel %vm420_vm4, %v2125_v16, %v2120_v31  ;;  %796 = vperm.xlu0 %2167, %v726_v22   ;;  %v3950_v22 = vld [vmem:[#allocation22_spill] sm:$0xff] }
  0xdc   :  { %863 = vmatprep.subr.bf16.mxu0 %v704_v13  ;;  %v3203_v52 = vmul.f32 %v2572_v56, %v432_v54  ;;  %v3207_v19 = vmul.f32 %v2574_v57, %v3178_v33  ;;  %v3211_v58 = vsel %vm469_vm5, %v431_v28, -1e+30  ;;  %v2136_v10 = vunpack.i.h.bf16 %v2134_v2 }
  0xdd   :  { %v703_v12 = vpack.c.bf16 %v663_v35, %v661_v27  ;;  %v2135_v29 = vunpack.i.l.bf16 %v2134_v2  ;;  %v2131_v62 = vunpack.i.h.bf16 %v2129_v6  ;;  %v2130_v16 = vunpack.i.l.bf16 %v2129_v6  ;;  %v728_v6 = vld [vmem:[%s3819_s3 + $0x78] sm:$0xff] }
  0xde   :  { %v3220_v31 = vmul.f32 %v2572_v56, %v431_v28  ;;  %v602_v30 = vadd.f32 %v3110_v43, %v3056_v17  ;;  %v604_v61 = vadd.f32 %v3074_v37, %v3014_v46  ;;  %v2144_v17 = vpop.permute.xlu1 %2143  ;;  %v2139_v43 = vpop.permute.xlu0 %2138  ;;  %v3250_v13 = vmul.f32 %v2574_v57, %v3200_v44  ;;  %801 = vperm.xlu1 %2168, %v727_v32  }
  0xdf   :  { %864 = vmatpush1.bf16.msra.mxu0 %v703_v12  ;;  %v170_v34 = vsel %vm156_vm1, %v2131_v62, %v2136_v10  ;;  %v186_v48 = vsel %vm156_vm1, %v2136_v10, %v2131_v62  ;;  %v169_v11 = vsel %vm156_vm1, %v2130_v16, %v2135_v29  ;;  %v185_v54 = vsel %vm156_vm1, %v2135_v29, %v2130_v16  ;;  %v3951_v29 = vld [vmem:[#allocation20_spill] sm:$0xff] }
  0xe0   :  { %v3239_v46 = vsel %vm207_vm3, %v186_v48, -1e+30  ;;  %v236_v37 = vsel %vm2566_vm2, %v170_v34, -1e+30  ;;  %v318_v28 = vmul.f32 %v2562_v47, %v186_v48  ;;  %v319_v2 = vmul.f32 %v2570_v55, %v170_v34  ;;  %806 = vperm.xlu0 %2167, %v728_v6  }
  0xe1   :  { %3948 = vst [vmem:[#allocation30_spill] sm:$0xff] %v3239_v46  ;;  %v3254_v27 = vsel %vm207_vm3, %v185_v54, -1e+30  ;;  %v520_v35 = vmax.f32 %v3036_v1, %v488_v59  ;;  %v3949_v5 = vsel %vm2620_vm6, %v3051_v21, -1e+30  ;;  %v3269_v62 = vmax.f32 %v3951_v29, %v236_v37  ;;  %v1024_v1 = vld [vmem:[%s3821_s5] sm:$0xff] }
  0xe2   :  { %v522_v12 = vmax.f32 %v3003_v26, %v3949_v5  ;;  %v3272_v16 = vadd.f32 %v318_v28, %v3950_v22  ;;  %v234_v15 = vsel %vm2566_vm2, %v169_v11, -1e+30  ;;  %v3280_v21 = vadd.f32 %v319_v2, %v3951_v29  ;;  %v3952_v26 = vld [vmem:[#allocation21_spill] sm:$0xff]  ;;  %v1025_v2 = vld [vmem:[%s3821_s5 + $0x8] sm:$0xff]  ;;  %1032 = vperm.xlu1 %2168, %v1024_v1  }
  0xe3   :  { %v634_v32 = vmul.f32 0.33333334, %v602_v30  ;;  %v636_v34 = vmul.f32 0.33333334, %v604_v61  ;;  %v316_v48 = vmul.f32 %v2562_v47, %v185_v54  ;;  %v317_v37 = vmul.f32 %v2570_v55, %v169_v11  ;;  %v3953_v30 = vld [vmem:[#allocation31_spill] sm:$0xff]  ;;  %v3955_v54 = vld [vmem:[#allocation14_spill] sm:$0xff] }
  0xe4   :  { %v601_v28 = vadd.f32 %v3102_v45, %v3045_v53  ;;  %v603_v5 = vadd.f32 %v3070_v14, %v3006_v0  ;;  %v3954_v61 = vmax.f32 %v3928_v36, %v3953_v30  ;;  %v3956_v11 = vld [vmem:[#allocation29_spill] sm:$0xff]  ;;  %v2154_v53 = vpop.permute.xlu1 %2153  ;;  %v2149_v45 = vpop.permute.xlu0 %2148  ;;  %v2146_v20 = vunpack.i.h.bf16 %v2144_v17  ;;  %v3958_v22 = vld [vmem:[#allocation19_spill] sm:$0xff]  ;;  %1037 = vperm.xlu0 %2167, %v1025_v2   ;;  %v1026_v36 = vld [vmem:[%s3821_s5 + $0x10] sm:$0xff] }
  0xe5   :  { %v666_v29 = vadd.f32 %v634_v32, %v520_v35  ;;  %v668_v10 = vadd.f32 %v636_v34, %v522_v12  ;;  %v3957_v59 = vmax.f32 %v3955_v54, %v3956_v11  ;;  %v2145_v46 = vunpack.i.l.bf16 %v2144_v17  ;;  %v1027_v1 = vld [vmem:[%s3821_s5 + $0x18] sm:$0xff]  ;;  %v1029_v11 = vld [vmem:[%s3821_s5 + $0x28] sm:$0xff] }
  0xe6   :  { %v519_v6 = vmax.f32 %v3954_v61, %v3081_v63  ;;  %v633_v0 = vmul.f32 0.33333334, %v601_v28  ;;  %v635_v14 = vmul.f32 0.33333334, %v603_v5  ;;  %v3302_v35 = vmax.f32 %v3958_v22, %v234_v15  ;;  %1042 = vperm.xlu1 %2168, %v1026_v36  }
  0xe7   :  { %v521_v51 = vmax.f32 %v3957_v59, %v3064_v18  ;;  %v706_v12 = vpack.c.bf16 %v668_v10, %v666_v29  ;;  %v2141_v32 = vunpack.i.h.bf16 %v2139_v43  ;;  %v2140_v34 = vunpack.i.l.bf16 %v2139_v43 }
  0xe8   :  { %v665_v63 = vadd.f32 %v633_v0, %v519_v6  ;;  %v2156_v59 = vunpack.i.h.bf16 %v2154_v53  ;;  %v2151_v30 = vunpack.i.h.bf16 %v2149_v45  ;;  %v3311_v17 = vadd.f32 %v316_v48, %v3952_v26  ;;  %1047 = vperm.xlu0 %2167, %v1027_v1  }
  0xe9   :  { %v667_v18 = vadd.f32 %v635_v14, %v521_v51  ;;  %865 = vmatprep.subr.bf16.mxu0 %v706_v12  ;;  %v434_v43 = vsel %vm420_vm4, %v2141_v32, %v2146_v20  ;;  %v3317_v10 = vsel %vm420_vm4, %v2146_v20, %v2141_v32  ;;  %v433_v51 = vsel %vm420_vm4, %v2140_v34, %v2145_v46 }
  0xea   :  { %v3322_v15 = vadd.f32 %v317_v37, %v3958_v22  ;;  %v3326_v5 = vsel %vm420_vm4, %v2145_v46, %v2140_v34  ;;  %v2155_v48 = vunpack.i.l.bf16 %v2154_v53  ;;  %v3330_v2 = vsel %vm469_vm5, %v434_v43, -1e+30  ;;  %v1028_v46 = vld [vmem:[%s3821_s5 + $0x20] sm:$0xff] }
  0xeb   :  { %v705_v28 = vpack.c.bf16 %v667_v18, %v665_v63  ;;  %v498_v20 = vsel %vm2620_vm6, %v3317_v10, -1e+30  ;;  %v3336_v29 = vmul.f32 %v2572_v56, %v434_v43  ;;  %v3340_v22 = vmul.f32 %v2574_v57, %v3317_v10  ;;  %1052 = vperm.xlu1 %2168, %v1028_v46   ;;  %v3959_v18 = vld [vmem:[#allocation26_spill] sm:$0xff] }
  0xec   :  { %v3347_v37 = vsel %vm469_vm5, %v433_v51, -1e+30  ;;  %v172_v61 = vsel %vm156_vm1, %v2151_v30, %v2156_v59  ;;  %v188_v6 = vsel %vm156_vm1, %v2156_v59, %v2151_v30  ;;  %v2150_v54 = vunpack.i.l.bf16 %v2149_v45  ;;  %v3960_v30 = vld [vmem:[#allocation24_spill] sm:$0xff]  ;;  %1057 = vperm.xlu0 %2167, %v1029_v11   ;;  %v2164_v11 = vpop.permute.xlu1 %2163 }
  0xed   :  { %866 = vmatpush1.bf16.msra.mxu0 %v705_v28  ;;  %v3358_v53 = vsel %vm207_vm3, %v188_v6, -1e+30  ;;  %v240_v0 = vsel %vm2566_vm2, %v172_v61, -1e+30  ;;  %v322_v14 = vmul.f32 %v2562_v47, %v188_v6  ;;  %v323_v12 = vmul.f32 %v2570_v55, %v172_v61 }
  0xee   :  { %v496_v32 = vsel %vm2620_vm6, %v3326_v5, -1e+30  ;;  %v577_v45 = vmul.f32 %v2572_v56, %v433_v51  ;;  %v171_v34 = vsel %vm156_vm1, %v2150_v54, %v2155_v48  ;;  %v187_v36 = vsel %vm156_vm1, %v2155_v48, %v2150_v54 }
  0xef   :  { %v578_v63 = vmul.f32 %v2574_v57, %v3326_v5  ;;  %v271_v59 = vmax.f32 %v3959_v18, %v3358_v53  ;;  %v3377_v1 = vmax.f32 %v3960_v30, %v240_v0  ;;  %v238_v43 = vsel %vm2566_vm2, %v171_v34, -1e+30  ;;  %v3961_v5 = vld [vmem:[#allocation23_spill] sm:$0xff]  ;;  %v2159_v0 = vpop.permute.xlu0 %2158  ;;  %v2172_v53 = vld [vmem:[#allocation2 + $0x18] sm:$0xff]  }
  0xf0   :  { %v3382_v51 = vadd.f32 %v322_v14, %v3959_v18  ;;  %v355_v28 = vadd.f32 %v323_v12, %v3960_v30  ;;  %v3387_v48 = vsel %vm207_vm3, %v187_v36, -1e+30  ;;  %v270_v46 = vmax.f32 %v3961_v5, %v238_v43  ;;  %v2173_v18 = vld [vmem:[#allocation2 + $0x20] sm:$0xff]  }
  0xf1   :  { %v320_v61 = vmul.f32 %v2562_v47, %v187_v36  ;;  %v321_v6 = vmul.f32 %v2570_v55, %v171_v34  ;;  %v606_v50 = vadd.f32 %v3250_v13, %v3189_v4  ;;  %v608_v54 = vadd.f32 %v3207_v19, %v3128_v8 }
  0xf2   :  { %v3962_v40 = vsel %vm2620_vm6, %v3200_v44, -1e+30  ;;  %v3963_v47 = vsel %vm2620_vm6, %v3178_v33, -1e+30  ;;  %v3964_v4 = vmax.f32 %v3942_v60, %v3119_v49  ;;  %v3965_v8 = vmax.f32 %v3940_v3, %v3092_v23 }
  0xf3   :  { %v524_v14 = vmax.f32 %v3172_v25, %v3962_v40  ;;  %v526_v55 = vmax.f32 %v3115_v39, %v3963_v47  ;;  %v638_v12 = vmul.f32 0.33333334, %v606_v50  ;;  %v640_v44 = vmul.f32 0.33333334, %v608_v54 }
  0xf4   :  { %v523_v13 = vmax.f32 %v3964_v4, %v3211_v58  ;;  %v525_v19 = vmax.f32 %v3965_v8, %v3193_v38  ;;  %v605_v25 = vadd.f32 %v3220_v31, %v3183_v41  ;;  %v607_v33 = vadd.f32 %v3203_v52, %v3125_v42  ;;  %v3966_v38 = vld [vmem:[#allocation25_spill] sm:$0xff] }
  0xf5   :  { %v2166_v34 = vunpack.i.h.bf16 %v2164_v11  ;;  %v2165_v39 = vunpack.i.l.bf16 %v2164_v11  ;;  %v2161_v36 = vunpack.i.h.bf16 %v2159_v0  ;;  %v2160_v30 = vunpack.i.l.bf16 %v2159_v0 }
  0xf6   :  { %v670_v43 = vadd.f32 %v638_v12, %v524_v14  ;;  %v672_v49 = vadd.f32 %v640_v44, %v526_v55  ;;  %v637_v60 = vmul.f32 0.33333334, %v605_v25  ;;  %v639_v58 = vmul.f32 0.33333334, %v607_v33 }
  0xf7   :  { %v436_v23 = vsel %vm420_vm4, %v2161_v36, %v2166_v34  ;;  %v452_v3 = vsel %vm420_vm4, %v2166_v34, %v2161_v36  ;;  %v435_v41 = vsel %vm420_vm4, %v2160_v30, %v2165_v39  ;;  %v451_v42 = vsel %vm420_vm4, %v2165_v39, %v2160_v30 }
  0xf8   :  { %v352_v52 = vadd.f32 %v320_v61, %v3966_v38  ;;  %v708_v31 = vpack.c.bf16 %v672_v49, %v670_v43  ;;  %v669_v50 = vadd.f32 %v637_v60, %v523_v13  ;;  %v671_v54 = vadd.f32 %v639_v58, %v525_v19 }
  0xf9   :  { %v353_v11 = vadd.f32 %v321_v6, %v3961_v5  ;;  %v501_v0 = vsel %vm469_vm5, %v436_v23, -1e+30  ;;  %v502_v40 = vsel %vm2620_vm6, %v452_v3, -1e+30  ;;  %v583_v14 = vmul.f32 %v2572_v56, %v436_v23 }
  0xfa   :  { %867 = vmatprep.subr.bf16.mxu0 %v708_v31  ;;  %v707_v47 = vpack.c.bf16 %v671_v54, %v669_v50  ;;  %v584_v55 = vmul.f32 %v2574_v57, %v452_v3  ;;  %v499_v61 = vsel %vm469_vm5, %v435_v41, -1e+30  ;;  %v582_v4 = vmul.f32 %v2574_v57, %v451_v42  ;;  %v2169_v3 = vld [vmem:[#allocation2] sm:$0xff]  }
  0xfb   :  { %v500_v5 = vsel %vm2620_vm6, %v451_v42, -1e+30  ;;  %v581_v6 = vmul.f32 %v2572_v56, %v435_v41  ;;  %v610_v13 = vadd.f32 %v578_v63, %v3322_v15  ;;  %v612_v8 = vadd.f32 %v3340_v22, %v3280_v21  ;;  %v3969_v22 = vld [vmem:[#allocation30_spill] sm:$0xff]  ;;  %v2170_v41 = vld [vmem:[#allocation2 + $0x8] sm:$0xff]   ;;  %v2171_v42 = vld [vmem:[#allocation2 + $0x10] sm:$0xff]  }
  0xfc   :  { %868 = vmatpush1.bf16.msra.mxu0 %v707_v47  ;;  %v528_v19 = vmax.f32 %v3302_v35, %v496_v32  ;;  %v530_v9 = vmax.f32 %v3269_v62, %v498_v20  ;;  %v609_v57 = vadd.f32 %v577_v45, %v3311_v17  ;;  %v611_v12 = vadd.f32 %v3336_v29, %v3272_v16  ;;  %v3968_v35 = vld [vmem:[#allocation22_spill] sm:$0xff] }
  0xfd   :  { %v642_v56 = vmul.f32 0.33333334, %v610_v13  ;;  %v644_v44 = vmul.f32 0.33333334, %v612_v8  ;;  %v3967_v21 = vmax.f32 %v3952_v26, %v3254_v27  ;;  %v3970_v7 = vmax.f32 %v3968_v35, %v3969_v22 }
  0xfe   :  { %v641_v10 = vmul.f32 0.33333334, %v609_v57  ;;  %v643_v63 = vmul.f32 0.33333334, %v611_v12  ;;  %v614_v62 = vadd.f32 %v582_v4, %v353_v11  ;;  %v616_v20 = vadd.f32 %v584_v55, %v355_v28 }
  0xff   :  { %v527_v15 = vmax.f32 %v3967_v21, %v3347_v37  ;;  %v529_v32 = vmax.f32 %v3970_v7, %v3330_v2  ;;  %v674_v17 = vadd.f32 %v642_v56, %v528_v19  ;;  %v676_v45 = vadd.f32 %v644_v44, %v530_v9 }
 0x100   :  { %v532_v25 = vmax.f32 %v270_v46, %v500_v5  ;;  %v534_v16 = vmax.f32 %v3377_v1, %v502_v40  ;;  %v646_v34 = vmul.f32 0.33333334, %v614_v62  ;;  %v648_v39 = vmul.f32 0.33333334, %v616_v20 }
 0x101   :  { %v673_v29 = vadd.f32 %v641_v10, %v527_v15  ;;  %v675_v33 = vadd.f32 %v643_v63, %v529_v32  ;;  %v269_v27 = vmax.f32 %v3966_v38, %v3387_v48  ;;  %v710_v26 = vpack.c.bf16 %v676_v45, %v674_v17  ;;  %v2175_v38 = vld [vmem:[#allocation2 + $0x30] sm:$0xff]  }
 0x102   :  { %v613_v37 = vadd.f32 %v581_v6, %v352_v52  ;;  %v615_v2 = vadd.f32 %v583_v14, %v3382_v51  ;;  %v678_v30 = vadd.f32 %v646_v34, %v532_v25  ;;  %v680_v43 = vadd.f32 %v648_v39, %v534_v16  ;;  %v2176_v52 = vld [vmem:[#allocation2 + $0x38] sm:$0xff]  }
 0x103   :  { %v709_v36 = vpack.c.bf16 %v675_v33, %v673_v29  ;;  %869 = vmatprep.subr.bf16.mxu0 %v710_v26  ;;  %v531_v28 = vmax.f32 %v269_v27, %v499_v61  ;;  %v533_v1 = vmax.f32 %v271_v59, %v501_v0  ;;  %v3971_v51 = vmov 0   ;;  %v2174_v59 = vld [vmem:[#allocation2 + $0x28] sm:$0xff]  }
 0x104   :  { %v645_v46 = vmul.f32 0.33333334, %v613_v37  ;;  %v647_v49 = vmul.f32 0.33333334, %v615_v2  ;;  %v712_v60 = vpack.c.bf16 %v680_v43, %v678_v30 }
 0x105   :  { %870 = vmatpush1.bf16.msra.mxu0 %v709_v36 }
 0x106   :  { %v677_v58 = vadd.f32 %v645_v46, %v531_v28  ;;  %v679_v23 = vadd.f32 %v647_v49, %v533_v1  ;;  %871 = vmatprep.subr.bf16.mxu0 %v712_v60 }
 0x108   :  { %v711_v48 = vpack.c.bf16 %v679_v23, %v677_v58 }
 0x10a   :  { %872 = vmatpush1.bf16.msra.mxu0 %v711_v48 }
 0x10d   :  { %890 = vmatmul.mubr.bf16.vlgmr.msra.gmra.mrb[0].mxu0 %v2169_v3 }
 0x10e   :  { %899 = vmatprep.mubr.bf16.mxu0 %v3971_v51 }
 0x115   :  { %900 = vmatmul.mubr.bf16.gmra.mrb[4].mxu0 %v2170_v41 }
 0x116   :  { %909 = vmatprep.mubr.bf16.mxu0 %v3971_v51 }
 0x11d   :  { %910 = vmatmul.mubr.bf16.gmra.mrb[8].mxu0 %v2171_v42 }
 0x11e   :  { %919 = vmatprep.mubr.bf16.mxu0 %v3971_v51 }
 0x125   :  { %920 = vmatmul.mubr.bf16.gmra.mrb[12].mxu0 %v2172_v53 }
 0x126   :  { %929 = vmatprep.mubr.bf16.mxu0 %v3971_v51 }
 0x12d   :  { %930 = vmatmul.mubr.bf16.gmra.mrb[16].mxu0 %v2173_v18 }
 0x12e   :  { %939 = vmatprep.mubr.bf16.mxu0 %v3971_v51 }
 0x135   :  { %940 = vmatmul.mubr.bf16.gmra.mrb[20].mxu0 %v2174_v59 }
 0x136   :  { %949 = vmatprep.mubr.bf16.mxu0 %v3971_v51 }
 0x13c   :  { %v737_v0 = vpop.permute.xlu1 %736 }
 0x13d   :  { %950 = vmatmul.mubr.bf16.gmra.mrb[24].mxu0 %v2175_v38 }
 0x13e   :  { %959 = vmatprep.mubr.bf16.mxu0 %v3971_v51  ;;  %v732_v31 = vpop.permute.xlu0 %731 }
 0x143   :  { %v747_v44 = vpop.permute.xlu0 %746 }
 0x144   :  { %v742_v19 = vpop.permute.xlu1 %741 }
 0x145   :  { %960 = vmatmul.mubr.bf16.gmra.mrb[28].mxu0 %v2176_v52 }
 0x148   :  { %v752_v17 = vpop.permute.xlu1 %751 }
 0x149   :  { %v757_v33 = vpop.permute.xlu0 %756 }
 0x14d   :  { %v762_v1 = vpop.permute.xlu1 %761  ;;  %v767_v23 = vpop.permute.xlu0 %766 }
 0x1e0   :  { %v891_v50 = vpop.f32.mrb[0].mxu0 }
 0x1e1   :  { %v892_v54 = vadd.f32 %v891_v50, %v732_v31  ;;  %v893_v11 = vpop.f32.mrb[1].mxu0  ;;  %v772_v50 = vpop.permute.xlu1 %771 }
 0x1e2   :  { %v894_v40 = vadd.f32 %v893_v11, %v732_v31  ;;  %v895_v14 = vpop.f32.mrb[2].mxu0 }
 0x1e3   :  { %v896_v47 = vadd.f32 %v895_v14, %v737_v0  ;;  %v897_v55 = vpop.f32.mrb[3].mxu0  ;;  %v970_v4 = vmax.f32 %v892_v54, 0.0  ;;  %v777_v14 = vpop.permute.xlu0 %776 }
 0x1e4   :  { %v898_v61 = vadd.f32 %v897_v55, %v737_v0  ;;  %v971_v6 = vmax.f32 %v894_v40, 0.0 }
 0x1e5   :  { %v972_v5 = vmax.f32 %v896_v47, 0.0 }
 0x1e6   :  { %v973_v13 = vmax.f32 %v898_v61, 0.0 }
 0x1e7   :  { %v1008_v8 = vpack.c.bf16 %v972_v5, %v970_v4 }
 0x1e8   :  { %v901_v9 = vpop.f32.mrb[4].mxu0  ;;  %v1009_v57 = vpack.c.bf16 %v973_v13, %v971_v6 }
 0x1e9   :  { %v902_v12 = vadd.f32 %v901_v9, %v742_v19  ;;  %v903_v56 = vpop.f32.mrb[5].mxu0 }
 0x1ea   :  { %v904_v21 = vadd.f32 %v903_v56, %v742_v19  ;;  %v905_v15 = vpop.f32.mrb[6].mxu0  ;;  %1078 = vmatprep.subr.bf16.mxu1 %v1009_v57  ;;  %v782_v57 = vpop.permute.xlu1 %781 }
 0x1eb   :  { %v906_v35 = vadd.f32 %v905_v15, %v747_v44  ;;  %v907_v22 = vpop.f32.mrb[7].mxu0  ;;  %1079 = vmatpush1.bf16.msra.mxu1 %v1008_v8  ;;  %v974_v32 = vmax.f32 %v902_v12, 0.0  ;;  %v787_v15 = vpop.permute.xlu0 %786 }
 0x1ec   :  { %v908_v7 = vadd.f32 %v907_v22, %v747_v44  ;;  %v975_v63 = vmax.f32 %v904_v21, 0.0 }
 0x1ed   :  { %v976_v10 = vmax.f32 %v906_v35, 0.0 }
 0x1ee   :  { %v977_v62 = vmax.f32 %v908_v7, 0.0 }
 0x1ef   :  { %v1010_v20 = vpack.c.bf16 %v976_v10, %v974_v32 }
 0x1f0   :  { %v1011_v45 = vpack.c.bf16 %v977_v62, %v975_v63  ;;  %v911_v25 = vpop.f32.mrb[8].mxu0 }
 0x1f1   :  { %v912_v16 = vadd.f32 %v911_v25, %v752_v17  ;;  %v913_v29 = vpop.f32.mrb[9].mxu0  ;;  %v792_v25 = vpop.permute.xlu1 %791 }
 0x1f2   :  { %v914_v34 = vadd.f32 %v913_v29, %v752_v17  ;;  %v915_v39 = vpop.f32.mrb[10].mxu0  ;;  %1080 = vmatprep.subr.bf16.mxu1 %v1011_v45 }
 0x1f3   :  { %v916_v27 = vadd.f32 %v915_v39, %v757_v33  ;;  %v917_v26 = vpop.f32.mrb[11].mxu0  ;;  %1081 = vmatpush1.bf16.msra.mxu1 %v1010_v20  ;;  %v978_v2 = vmax.f32 %v912_v16, 0.0  ;;  %v797_v39 = vpop.permute.xlu0 %796 }
 0x1f4   :  { %v918_v37 = vadd.f32 %v917_v26, %v757_v33  ;;  %v979_v30 = vmax.f32 %v914_v34, 0.0 }
 0x1f5   :  { %v980_v36 = vmax.f32 %v916_v27, 0.0 }
 0x1f6   :  { %v981_v43 = vmax.f32 %v918_v37, 0.0 }
 0x1f7   :  { %v1012_v28 = vpack.c.bf16 %v980_v36, %v978_v2 }
 0x1f8   :  { %v1013_v46 = vpack.c.bf16 %v981_v43, %v979_v30  ;;  %v921_v49 = vpop.f32.mrb[12].mxu0 }
 0x1f9   :  { %v922_v60 = vadd.f32 %v921_v49, %v762_v1  ;;  %v923_v58 = vpop.f32.mrb[13].mxu0  ;;  %v802_v49 = vpop.permute.xlu1 %801 }
 0x1fa   :  { %v924_v48 = vadd.f32 %v923_v58, %v762_v1  ;;  %v925_v3 = vpop.f32.mrb[14].mxu0  ;;  %1082 = vmatprep.subr.bf16.mxu1 %v1013_v46 }
 0x1fb   :  { %v926_v41 = vadd.f32 %v925_v3, %v767_v23  ;;  %v927_v42 = vpop.f32.mrb[15].mxu0  ;;  %1083 = vmatpush1.bf16.msra.mxu1 %v1012_v28  ;;  %v982_v18 = vmax.f32 %v922_v60, 0.0  ;;  %v807_v3 = vpop.permute.xlu0 %806 }
 0x1fc   :  { %v928_v53 = vadd.f32 %v927_v42, %v767_v23  ;;  %v983_v38 = vmax.f32 %v924_v48, 0.0 }
 0x1fd   :  { %v984_v59 = vmax.f32 %v926_v41, 0.0 }
 0x1fe   :  { %v985_v52 = vmax.f32 %v928_v53, 0.0 }
 0x1ff   :  { %v1014_v31 = vpack.c.bf16 %v984_v59, %v982_v18 }
 0x200   :  { %v1015_v54 = vpack.c.bf16 %v985_v52, %v983_v38  ;;  %v931_v11 = vpop.f32.mrb[16].mxu0 }
 0x201   :  { %v932_v0 = vadd.f32 %v931_v11, %v772_v50  ;;  %v933_v40 = vpop.f32.mrb[17].mxu0 }
 0x202   :  { %v934_v47 = vadd.f32 %v933_v40, %v772_v50  ;;  %v935_v55 = vpop.f32.mrb[18].mxu0  ;;  %1084 = vmatprep.subr.bf16.mxu1 %v1015_v54  ;;  %v2178_v40 = vld [vmem:[%s3820_s4 + $0x8] sm:$0xff]  }
 0x203   :  { %v936_v61 = vadd.f32 %v935_v55, %v777_v14  ;;  %v937_v4 = vpop.f32.mrb[19].mxu0  ;;  %1085 = vmatpush1.bf16.msra.mxu1 %v1014_v31  ;;  %v986_v6 = vmax.f32 %v932_v0, 0.0  ;;  %v2177_v0 = vld [vmem:[%s3820_s4] sm:$0xff]  }
 0x204   :  { %v938_v5 = vadd.f32 %v937_v4, %v777_v14  ;;  %v987_v8 = vmax.f32 %v934_v47, 0.0  ;;  %v2179_v14 = vld [vmem:[%s3820_s4 + $0x10] sm:$0xff]   ;;  %v1033_v47 = vpop.permute.xlu1 %1032 }
 0x205   :  { %v988_v13 = vmax.f32 %v936_v61, 0.0 }
 0x206   :  { %v989_v19 = vmax.f32 %v938_v5, 0.0  ;;  %v1038_v5 = vpop.permute.xlu0 %1037 }
 0x207   :  { %v1016_v9 = vpack.c.bf16 %v988_v13, %v986_v6 }
 0x208   :  { %v1017_v12 = vpack.c.bf16 %v989_v19, %v987_v8  ;;  %v941_v56 = vpop.f32.mrb[20].mxu0 }
 0x209   :  { %v942_v44 = vadd.f32 %v941_v56, %v782_v57  ;;  %v943_v21 = vpop.f32.mrb[21].mxu0 }
 0x20a   :  { %v944_v35 = vadd.f32 %v943_v21, %v782_v57  ;;  %v945_v22 = vpop.f32.mrb[22].mxu0  ;;  %1086 = vmatprep.subr.bf16.mxu1 %v1017_v12 }
 0x20b   :  { %v946_v7 = vadd.f32 %v945_v22, %v787_v15  ;;  %v947_v32 = vpop.f32.mrb[23].mxu0  ;;  %1087 = vmatpush1.bf16.msra.mxu1 %v1016_v9  ;;  %v990_v63 = vmax.f32 %v942_v44, 0.0  ;;  %v1048_v44 = vpop.permute.xlu0 %1047 }
 0x20c   :  { %v948_v10 = vadd.f32 %v947_v32, %v787_v15  ;;  %v991_v20 = vmax.f32 %v944_v35, 0.0 }
 0x20d   :  { %v992_v62 = vmax.f32 %v946_v7, 0.0 }
 0x20e   :  { %v993_v17 = vmax.f32 %v948_v10, 0.0 }
 0x20f   :  { %v1018_v45 = vpack.c.bf16 %v992_v62, %v990_v63 }
 0x210   :  { %v1019_v16 = vpack.c.bf16 %v993_v17, %v991_v20  ;;  %v951_v29 = vpop.f32.mrb[24].mxu0  ;;  %v3972_v17 = vld [vmem:[#allocation27_spill] sm:$0xff] }
 0x211   :  { %v952_v33 = vadd.f32 %v951_v29, %v792_v25  ;;  %v953_v34 = vpop.f32.mrb[25].mxu0 }
 0x212   :  { %v954_v27 = vadd.f32 %v953_v34, %v792_v25  ;;  %v955_v26 = vpop.f32.mrb[26].mxu0  ;;  %1088 = vmatprep.subr.bf16.mxu1 %v1019_v16 }
 0x213   :  { %v956_v37 = vadd.f32 %v955_v26, %v797_v39  ;;  %v957_v2 = vpop.f32.mrb[27].mxu0  ;;  %1089 = vmatpush1.bf16.msra.mxu1 %v1018_v45  ;;  %v994_v30 = vmax.f32 %v952_v33, 0.0  ;;  %v1167_v45 = vsub.s32 2, %v3972_v17  ;;  %v1171_v33 = vsub.s32 6, %v3972_v17 }
 0x214   :  { %v958_v36 = vadd.f32 %v957_v2, %v797_v39  ;;  %v995_v28 = vmax.f32 %v954_v27, 0.0  ;;  %v2307_v27 = vmov 1983009808  }
 0x215   :  { %v996_v43 = vmax.f32 %v956_v37, 0.0  ;;  %v1191_v26 = vunpack.c.l.s4 %v2307_v27 }
 0x216   :  { %v997_v1 = vmax.f32 %v958_v36, 0.0  ;;  %v1058_v36 = vpop.permute.xlu0 %1057 }
 0x217   :  { %v1020_v46 = vpack.c.bf16 %v996_v43, %v994_v30 }
 0x218   :  { %v1021_v60 = vpack.c.bf16 %v997_v1, %v995_v28  ;;  %v961_v58 = vpop.f32.mrb[28].mxu0  ;;  %v2252_v28 = vld [vmem:[%s3817_s1] sm:$0x77]  ;;  %s2310_s1 = smov [#allocation5]  }
 0x219   :  { %v962_v23 = vadd.f32 %v961_v58, %v802_v49  ;;  %v963_v48 = vpop.f32.mrb[29].mxu0  ;;  %v1168_v1 = vrot.slane %v2252_v28, %v1167_v45  ;;  %s1970_s26 = sshll.u32 %s2310_s1, 4  ;;  %s1971_s26 = int_to_ptr.vmem [resolvable:$true] %s1970_s26 }
 0x21a   :  { %v964_v41 = vadd.f32 %v963_v48, %v802_v49  ;;  %v965_v42 = vpop.f32.mrb[30].mxu0  ;;  %1090 = vmatprep.subr.bf16.mxu1 %v1021_v60  ;;  %v1172_v60 = vrot.slane %v2252_v28, %v1171_v33  ;;  %v1192_v48 = vunpack.c.0.s8 %v1191_v26  ;;  %s2275_s22 = scalar_lea.vmem %s1971_s26, 768  ;;  %p2280_p9 = scmp.lt.s32.totalorder %s1971_s26, %s1971_s26 }
 0x21b   :  { %v966_v53 = vadd.f32 %v965_v42, %v807_v3  ;;  %v967_v18 = vpop.f32.mrb[31].mxu0  ;;  %1091 = vmatpush1.bf16.msra.mxu1 %v1020_v46  ;;  %v998_v38 = vmax.f32 %v962_v23, 0.0  ;;  %p2276_p8 = scmp.ne.s32.totalorder %s1971_s26, %s2275_s22  ;;  %p2281_p10 = scmp.lt.s32.totalorder %s2275_s22, %s2275_s22 }
 0x21c   :  { %v968_v59 = vadd.f32 %v967_v18, %v807_v3  ;;  %v999_v31 = vmax.f32 %v964_v41, 0.0  ;;  %v2308_v3 = vmov 1934713408  }
 0x21d   :  { %v1000_v52 = vmax.f32 %v966_v53, 0.0  ;;  %v1222_v41 = vunpack.c.l.s4 %v2308_v3  ;;  %p2282_p11 = por %p2281_p10, %p2280_p9 }
 0x21e   :  { %v1001_v50 = vmax.f32 %v968_v59, 0.0  ;;  %v1178_v59 = vrot.slane %v1168_v1, %v1167_v45 }
 0x21f   :  { %v1022_v54 = vpack.c.bf16 %v1000_v52, %v998_v38  ;;  %v1182_v38 = vrot.slane %v1172_v60, %v1167_v45  ;;  %v3491_v52 = vsub.s32 %v1192_v48, %v3972_v17  ;;  %p2283_p12 = pnand %p2282_p11, %p2276_p8 }
 0x220   :  { %v1023_v11 = vpack.c.bf16 %v1001_v50, %v999_v31  ;;  %v1223_v31 = vunpack.c.0.s8 %v1222_v41 }
 0x222   :  { %1092 = vmatprep.subr.bf16.mxu1 %v1023_v11 }
 0x223   :  { %1093 = vmatpush1.bf16.msra.mxu1 %v1022_v54 }
 0x226   :  { %1111 = vmatmul.mubr.bf16.vlgmr.msra.gmra.mrb[0].mxu1 %v2177_v0 }
 0x227   :  { %1120 = vmatprep.mubr.bf16.mxu1 %v3971_v51 }
 0x22e   :  { %1121 = vmatmul.mubr.bf16.gmra.mrb[4].mxu1 %v2178_v40 }
 0x22f   :  { %1130 = vmatprep.mubr.bf16.mxu1 %v3971_v51  ;;  %v1043_v51 = vpop.permute.xlu1 %1042 }
 0x233   :  { %v1053_v16 = vpop.permute.xlu1 %1052 }
 0x236   :  { %1131 = vmatmul.mubr.bf16.gmra.mrb[8].mxu1 %v2179_v14 }
 0x2f9   :  { %v1112_v55 = vpop.f32.mrb[0].mxu1 }
 0x2fa   :  { %v1113_v61 = vadd.f32 %v1112_v55, %v1033_v47  ;;  %v1114_v4 = vpop.f32.mrb[1].mxu1 }
 0x2fb   :  { %v1115_v6 = vadd.f32 %v1114_v4, %v1033_v47  ;;  %v1116_v13 = vpop.f32.mrb[2].mxu1  ;;  %v3495_v4 = vsub.s32 %v1223_v31, %v3972_v17 }
 0x2fc   :  { %2180 = vtanh.f32 %v1113_v61  ;;  %v1117_v8 = vadd.f32 %v1116_v13, %v1038_v5  ;;  %v1118_v19 = vpop.f32.mrb[3].mxu1 }
 0x2fd   :  { %2182 = vtanh.f32 %v1115_v6  ;;  %v1119_v9 = vadd.f32 %v1118_v19, %v1038_v5 }
 0x2fe   :  { %2184 = vtanh.f32 %v1117_v8  ;;  %v2309_v8 = vmov 0.0  }
 0x2ff   :  { %2186 = vtanh.f32 %v1119_v9 }
 0x301   :  { %v1122_v57 = vpop.f32.mrb[4].mxu1 }
 0x302   :  { %v1123_v12 = vadd.f32 %v1122_v57, %v1043_v51  ;;  %v1124_v56 = vpop.f32.mrb[5].mxu1 }
 0x303   :  { %v1125_v21 = vadd.f32 %v1124_v56, %v1043_v51  ;;  %v1126_v15 = vpop.f32.mrb[6].mxu1 }
 0x304   :  { %2188 = vtanh.f32 %v1123_v12  ;;  %v1127_v35 = vadd.f32 %v1126_v15, %v1048_v44  ;;  %v1128_v22 = vpop.f32.mrb[7].mxu1 }
 0x305   :  { %2190 = vtanh.f32 %v1125_v21  ;;  %v1129_v7 = vadd.f32 %v1128_v22, %v1048_v44 }
 0x306   :  { %v2181_v32 = vpop.eup %2180  ;;  %1147 = vst [vmem:[#allocation5] sm:$0xff] %v1127_v35 }
 0x307   :  { %v2183_v10 = vpop.eup %2182  ;;  %v1153_v63 = vmul.f32 1.442695, %v2181_v32  ;;  %1148 = vst [vmem:[#allocation5 + $0x8] sm:$0xff] %v1129_v7 }
 0x308   :  { %v2185_v62 = vpop.eup %2184  ;;  %v1155_v20 = vmul.f32 1.442695, %v2183_v10 }
 0x309   :  { %v2187_v25 = vpop.eup %2186  ;;  %2192 = vpow2.f32 %v1153_v63  ;;  %v1157_v29 = vmul.f32 1.442695, %v2185_v62  ;;  %v1132_v34 = vpop.f32.mrb[8].mxu1 }
 0x30a   :  { %2194 = vpow2.f32 %v1155_v20  ;;  %v1159_v39 = vmul.f32 1.442695, %v2187_v25  ;;  %v1133_v37 = vadd.f32 %v1132_v34, %v1053_v16  ;;  %v1134_v2 = vpop.f32.mrb[9].mxu1 }
 0x30b   :  { %2196 = vpow2.f32 %v1157_v29  ;;  %v1135_v30 = vadd.f32 %v1134_v2, %v1053_v16  ;;  %v1136_v43 = vpop.f32.mrb[10].mxu1 }
 0x30c   :  { %2198 = vpow2.f32 %v1159_v39  ;;  %1149 = vst [vmem:[#allocation5 + $0x10] sm:$0xff] %v1133_v37  ;;  %v1137_v46 = vadd.f32 %v1136_v43, %v1058_v36  ;;  %v1138_v49 = vpop.f32.mrb[11].mxu1 }
 0x30d   :  { %1150 = vst [vmem:[#allocation5 + $0x18] sm:$0xff] %v1135_v30  ;;  %v1139_v58 = vadd.f32 %v1138_v49, %v1058_v36 }
 0x30e   :  { %v2189_v23 = vpop.eup %2188  ;;  %1151 = vst [vmem:[#allocation5 + $0x20] sm:$0xff] %v1137_v46 }
 0x30f   :  { %v2191_v42 = vpop.eup %2190  ;;  %v1161_v53 = vmul.f32 1.442695, %v2189_v23  ;;  %1152 = vst [vmem:[#allocation5 + $0x28] sm:$0xff] %v1139_v58 }
 0x310   :  { %v1163_v18 = vmul.f32 1.442695, %v2191_v42 }
 0x311   :  { %2200 = vpow2.f32 %v1161_v53 }
 0x312   :  { %2202 = vpow2.f32 %v1163_v18 }
 0x313   :  { %v2193_v50 = vpop.eup %2192 }
 0x314   :  { %v2195_v54 = vpop.eup %2194  ;;  %v1183_v11 = vmul.f32 %v2193_v50, %v1178_v59 }
 0x315   :  { %v2197_v0 = vpop.eup %2196  ;;  %v1184_v40 = vmul.f32 %v2195_v54, %v1182_v38 }
 0x316   :  { %v2199_v14 = vpop.eup %2198  ;;  %v1460_v47 = vmul.f32 %v1183_v11, %v1127_v35  ;;  %v1185_v55 = vmul.f32 %v2197_v0, %v1178_v59  ;;  %v1196_v61 = vrot.slane %v1183_v11, %v3491_v52  ;;  %v1189_v19 = vcombine.high %v1183_v11, %v2309_v8 }
 0x317   :  { %v1461_v5 = vmul.f32 %v1184_v40, %v1129_v7  ;;  %v1186_v6 = vmul.f32 %v2199_v14, %v1182_v38  ;;  %v1211_v13 = vrot.slane %v1184_v40, %v3491_v52  ;;  %v1204_v56 = vcombine.high %v1184_v40, %v2309_v8 }
 0x318   :  { %v1462_v9 = vmul.f32 %v1185_v55, %v1133_v37  ;;  %v1262_v51 = vrot.slane %v1185_v55, %v3491_v52  ;;  %v1203_v22 = vrot.slane %v1189_v19, %v3491_v52  ;;  %v1473_v39 = vrot.slane %v1460_v47, %v3491_v52 }
 0x319   :  { %v3500_v57 = vmul.f32 %v1186_v6, %v1135_v30  ;;  %v1220_v12 = vcombine.high %v1196_v61, %v1211_v13  ;;  %v1219_v44 = vcombine.low %v1196_v61, %v1211_v13  ;;  %v1277_v21 = vrot.slane %v1186_v6, %v3491_v52 }
 0x31a   :  { %v1218_v25 = vrot.slane %v1204_v56, %v3491_v52  ;;  %v1488_v27 = vrot.slane %v1461_v5, %v3491_v52  ;;  %v1255_v60 = vcombine.high %v1185_v55, %v2309_v8  ;;  %v3539_v48 = vrot.slane %v1462_v9, %v3491_v52 }
 0x31b   :  { %v2201_v15 = vpop.eup %2200  ;;  %v1234_v35 = vrot.slane %v1220_v12, %v3495_v4  ;;  %v1227_v10 = vrot.slane %v1219_v44, %v3495_v4  ;;  %v1286_v63 = vcombine.high %v1262_v51, %v1277_v21  ;;  %v1285_v62 = vcombine.low %v1262_v51, %v1277_v21 }
 0x31c   :  { %v2203_v7 = vpop.eup %2202  ;;  %v3506_v32 = vmul.f32 %v2201_v15, %v1178_v59  ;;  %v1235_v37 = vcombine.low %v1203_v22, %v1218_v25  ;;  %v1236_v23 = vcombine.high %v1203_v22, %v1218_v25  ;;  %v3543_v3 = vrot.slane %v3500_v57, %v3491_v52 }
 0x31d   :  { %v3509_v20 = vmul.f32 %v2203_v7, %v1182_v38  ;;  %v1394_v45 = vsel %vm1387_vm7, %v1234_v35, 0.0  ;;  %v1388_v29 = vsel %vm1387_vm7, %v1227_v10, 0.0  ;;  %v1300_v33 = vrot.slane %v1286_v63, %v3495_v4 }
 0x31e   :  { %v1464_v16 = vmul.f32 %v3506_v32, %v1137_v46  ;;  %1395 = vadd.xlane.f32.xlu0 %v1394_v45  ;;  %v1251_v34 = vcombine.high %v1227_v10, %v2309_v8  ;;  %1389 = vadd.xlane.f32.xlu1 %v1388_v29  ;;  %v1252_v30 = vcombine.high %v1234_v35, %v2309_v8 }
 0x31f   :  { %v1465_v26 = vmul.f32 %v3509_v20, %v1139_v58  ;;  %v1293_v46 = vrot.slane %v1285_v62, %v3495_v4  ;;  %v1418_v49 = vsel %vm1387_vm7, %v1300_v33, 0.0  ;;  %v1270_v58 = vcombine.high %v1186_v6, %v2309_v8 }
 0x320   :  { %v3521_v2 = vcombine.high %v1464_v16, %v2309_v8  ;;  %v3524_v36 = vrot.slane %v1464_v16, %v3491_v52  ;;  %v1391_v1 = vsel %vm1387_vm7, %v1251_v34, 0.0  ;;  %v1496_v41 = vcombine.low %v1473_v39, %v1488_v27 }
 0x321   :  { %v3528_v43 = vcombine.high %v1465_v26, %v2309_v8  ;;  %v3531_v28 = vrot.slane %v1465_v26, %v3491_v52  ;;  %v1497_v42 = vcombine.high %v1473_v39, %v1488_v27  ;;  %v1243_v53 = vrot.slane %v1235_v37, %v3495_v4 }
 0x322   :  { %1392 = vadd.xlane.f32.xlu0 %v1391_v1  ;;  %1419 = vadd.xlane.f32.xlu1 %v1418_v49  ;;  %v1269_v18 = vrot.slane %v1255_v60, %v3491_v52  ;;  %v1284_v59 = vrot.slane %v1270_v58, %v3491_v52  ;;  %v1466_v38 = vcombine.high %v1460_v47, %v2309_v8  ;;  %v1412_v50 = vsel %vm1387_vm7, %v1293_v46, 0.0 }
 0x323   :  { %v1481_v31 = vcombine.high %v1461_v5, %v2309_v8  ;;  %v1397_v54 = vsel %vm1387_vm7, %v1252_v30, 0.0  ;;  %v1317_v11 = vcombine.high %v1293_v46, %v2309_v8  ;;  %v1562_v14 = vcombine.low %v3539_v48, %v3543_v3 }
 0x324   :  { %v1301_v0 = vcombine.low %v1269_v18, %v1284_v59  ;;  %v1302_v40 = vcombine.high %v1269_v18, %v1284_v59  ;;  %v1532_v55 = vcombine.high %v1462_v9, %v2309_v8  ;;  %v1400_v61 = vsel %vm1387_vm7, %v1243_v53, 0.0 }
 0x325   :  { %v1250_v47 = vrot.slane %v1236_v23, %v3495_v4  ;;  %v3559_v5 = vrot.slane %v1466_v38, %v3491_v52  ;;  %v3562_v6 = vrot.slane %v1481_v31, %v3491_v52  ;;  %v1563_v13 = vcombine.high %v3539_v48, %v3543_v3 }
 0x326   :  { %1413 = vadd.xlane.f32.xlu0 %v1412_v50  ;;  %1398 = vadd.xlane.f32.xlu1 %v1397_v54  ;;  %v1547_v19 = vcombine.high %v3500_v57, %v2309_v8  ;;  %v1415_v51 = vsel %vm1387_vm7, %v1317_v11, 0.0  ;;  %v3570_v9 = vrot.slane %v1301_v0, %v3495_v4  ;;  %v1318_v12 = vcombine.high %v1300_v33, %v2309_v8 }
 0x327   :  { %v1512_v56 = vcombine.low %v3559_v5, %v3562_v6  ;;  %v1513_v44 = vcombine.high %v3559_v5, %v3562_v6  ;;  %v1504_v21 = vrot.slane %v1496_v41, %v3495_v4  ;;  %v1406_v15 = vsel %vm1387_vm7, %v1250_v47, 0.0 }
 0x328   :  { %v1253_v57 = vcombine.high %v1243_v53, %v2309_v8  ;;  %v3581_v35 = vrot.slane %v1497_v42, %v3495_v4  ;;  %v1546_v22 = vrot.slane %v1532_v55, %v3491_v52  ;;  %v1424_v7 = vsel %vm1387_vm7, %v3570_v9, 0.0 }
 0x329   :  { %v1561_v10 = vrot.slane %v1547_v19, %v3491_v52  ;;  %v1421_v63 = vsel %vm1387_vm7, %v1318_v12, 0.0  ;;  %v1254_v62 = vcombine.high %v1250_v47, %v2309_v8  ;;  %v1328_v25 = vrot.slane %v3506_v32, %v3491_v52 }
 0x32a   :  { %1401 = vadd.xlane.f32.xlu0 %v1400_v61  ;;  %1416 = vadd.xlane.f32.xlu1 %v1415_v51  ;;  %v1343_v16 = vrot.slane %v3509_v20, %v3491_v52  ;;  %v1664_v33 = vsel %vm1387_vm7, %v1504_v21, 0.0  ;;  %v1403_v34 = vsel %vm1387_vm7, %v1253_v57, 0.0  ;;  %v1670_v39 = vsel %vm1387_vm7, %v3581_v35, 0.0 }
 0x32b   :  { %v1578_v45 = vcombine.low %v1546_v22, %v1561_v10  ;;  %v1579_v29 = vcombine.high %v1546_v22, %v1561_v10  ;;  %v1321_v27 = vcombine.high %v3506_v32, %v2309_v8  ;;  %v3600_v26 = vrot.slane %v1302_v40, %v3495_v4 }
 0x32c   :  { %v1351_v30 = vcombine.low %v1328_v25, %v1343_v16  ;;  %v1352_v1 = vcombine.high %v1328_v25, %v1343_v16  ;;  %v1409_v46 = vsel %vm1387_vm7, %v1254_v62, 0.0  ;;  %v1336_v60 = vcombine.high %v3509_v20, %v2309_v8 }
 0x32d   :  { %v3603_v37 = vrot.slane %v1578_v45, %v3495_v4  ;;  %v1335_v49 = vrot.slane %v1321_v27, %v3491_v52  ;;  %v1628_v32 = vcombine.low %v3524_v36, %v3531_v28  ;;  %v3612_v58 = vrot.slane %v1562_v14, %v3495_v4 }
 0x32e   :  { %1407 = vadd.xlane.f32.xlu0 %v1406_v15  ;;  %1425 = vadd.xlane.f32.xlu1 %v1424_v7  ;;  %v1528_v23 = vcombine.high %v1504_v21, %v2309_v8  ;;  %v3616_v41 = vrot.slane %v1351_v30, %v3495_v4  ;;  %v3619_v42 = vrot.slane %v1352_v1, %v3495_v4  ;;  %v1430_v38 = vsel %vm1387_vm7, %v3600_v26, 0.0 }
 0x32f   :  { %v1596_v53 = vcombine.high %v3603_v37, %v2309_v8  ;;  %v1350_v18 = vrot.slane %v1336_v60, %v3491_v52  ;;  %v1636_v20 = vrot.slane %v1628_v32, %v3495_v4  ;;  %v1629_v59 = vcombine.high %v3524_v36, %v3531_v28 }
 0x330   :  { %v3630_v31 = vrot.slane %v1579_v29, %v3495_v4  ;;  %v1383_v50 = vcombine.high %v3616_v41, %v2309_v8  ;;  %v1384_v54 = vcombine.high %v3619_v42, %v2309_v8  ;;  %v1612_v51 = vrot.slane %v3521_v2, %v3491_v52 }
 0x331   :  { %v3637_v11 = vsel %vm1387_vm7, %v1596_v53, 0.0  ;;  %v1367_v0 = vcombine.low %v1335_v49, %v1350_v18  ;;  %v1368_v40 = vcombine.high %v1335_v49, %v1350_v18  ;;  %v3640_v36 = vsel %vm1387_vm7, %v1636_v20, 0.0 }
 0x332   :  { %1665 = vadd.xlane.f32.xlu0 %v1664_v33  ;;  %1404 = vadd.xlane.f32.xlu1 %v1403_v34  ;;  %v3643_v28 = vsel %vm1387_vm7, %v1383_v50, 0.0  ;;  %v3646_v14 = vsel %vm1387_vm7, %v1384_v54, 0.0  ;;  %v1643_v55 = vrot.slane %v1629_v59, %v3495_v4  ;;  %v1660_v61 = vcombine.high %v1636_v20, %v2309_v8 }
 0x333   :  { %v1375_v47 = vrot.slane %v1367_v0, %v3495_v4  ;;  %v1382_v19 = vrot.slane %v1368_v40, %v3495_v4  ;;  %v1627_v12 = vrot.slane %v3528_v43, %v3491_v52  ;;  %v1597_v22 = vcombine.high %v3630_v31, %v2309_v8 }
 0x334   :  { %v3657_v21 = vsel %vm1387_vm7, %v1643_v55, 0.0  ;;  %v3660_v15 = vsel %vm1387_vm7, %v1660_v61, 0.0  ;;  %v1661_v57 = vcombine.high %v1643_v55, %v2309_v8  ;;  %v1688_v25 = vsel %vm1387_vm7, %v3612_v58, 0.0 }
 0x335   :  { %v1448_v7 = vsel %vm1387_vm7, %v1375_v47, 0.0  ;;  %v1454_v2 = vsel %vm1387_vm7, %v1382_v19, 0.0  ;;  %v1385_v10 = vcombine.high %v1375_v47, %v2309_v8  ;;  %v1386_v52 = vcombine.high %v1382_v19, %v2309_v8 }
 0x336   :  { %1671 = vadd.xlane.f32.xlu0 %v1670_v39  ;;  %1431 = vadd.xlane.f32.xlu1 %v1430_v38  ;;  %v1644_v43 = vcombine.low %v1612_v51, %v1627_v12  ;;  %v1645_v62 = vcombine.high %v1612_v51, %v1627_v12  ;;  %v3673_v45 = vsel %vm1387_vm7, %v1597_v22, 0.0  ;;  %v1520_v16 = vrot.slane %v1512_v56, %v3495_v4 }
 0x337   :  { %v1451_v29 = vsel %vm1387_vm7, %v1385_v10, 0.0  ;;  %v1457_v33 = vsel %vm1387_vm7, %v1386_v52, 0.0  ;;  %v1667_v34 = vsel %vm1387_vm7, %v1528_v23, 0.0  ;;  %v1577_v39 = vrot.slane %v1563_v13, %v3495_v4 }
 0x338   :  { %v1652_v27 = vrot.slane %v1644_v43, %v3495_v4  ;;  %v1659_v30 = vrot.slane %v1645_v62, %v3495_v4  ;;  %v1676_v60 = vsel %vm1387_vm7, %v1520_v16, 0.0  ;;  %v1527_v48 = vrot.slane %v1513_v44, %v3495_v4 }
 0x339   :  { %v1694_v3 = vsel %vm1387_vm7, %v1577_v39, 0.0  ;;  %v1529_v13 = vcombine.high %v3581_v35, %v2309_v8  ;;  %v1319_v18 = vcombine.high %v3570_v9, %v2309_v8  ;;  %v1594_v4 = vcombine.high %v3612_v58, %v2309_v8 }
 0x33a   :  { %1422 = vadd.xlane.f32.xlu0 %v1421_v63  ;;  %1410 = vadd.xlane.f32.xlu1 %v1409_v46  ;;  %v3670_v63 = vsel %vm1387_vm7, %v1661_v57, 0.0  ;;  %v1724_v1 = vsel %vm1387_vm7, %v1652_v27, 0.0  ;;  %v1730_v56 = vsel %vm1387_vm7, %v1659_v30, 0.0  ;;  %v1662_v46 = vcombine.high %v1652_v27, %v2309_v8 }
 0x33b   :  { %v1663_v49 = vcombine.high %v1659_v30, %v2309_v8  ;;  %v1682_v53 = vsel %vm1387_vm7, %v1527_v48, 0.0  ;;  %v1673_v5 = vsel %vm1387_vm7, %v1529_v13, 0.0  ;;  %v1427_v6 = vsel %vm1387_vm7, %v1319_v18, 0.0 }
 0x33c   :  { %v1727_v32 = vsel %vm1387_vm7, %v1662_v46, 0.0  ;;  %v1320_v44 = vcombine.high %v3600_v26, %v2309_v8  ;;  %v1691_v35 = vsel %vm1387_vm7, %v1594_v4, 0.0  ;;  %v1595_v9 = vcombine.high %v1577_v39, %v2309_v8 }
 0x33d   :  { %v1733_v23 = vsel %vm1387_vm7, %v1663_v49, 0.0  ;;  %v1700_v59 = vsel %vm1387_vm7, %v3603_v37, 0.0  ;;  %v1530_v58 = vcombine.high %v1520_v16, %v2309_v8  ;;  %v1436_v50 = vsel %vm1387_vm7, %v3616_v41, 0.0 }
 0x33e   :  { %1689 = vadd.xlane.f32.xlu0 %v1688_v25  ;;  %1668 = vadd.xlane.f32.xlu1 %v1667_v34  ;;  %v1433_v20 = vsel %vm1387_vm7, %v1320_v44, 0.0  ;;  %v1697_v38 = vsel %vm1387_vm7, %v1595_v9, 0.0  ;;  %v1706_v54 = vsel %vm1387_vm7, %v3630_v31, 0.0  ;;  %v1531_v0 = vcombine.high %v1527_v48, %v2309_v8 }
 0x33f   :  { %v1679_v26 = vsel %vm1387_vm7, %v1530_v58, 0.0  ;;  %v1442_v37 = vsel %vm1387_vm7, %v3619_v42, 0.0 }
 0x340   :  { %v1685_v40 = vsel %vm1387_vm7, %v1531_v0, 0.0 }
 0x342   :  { %1677 = vadd.xlane.f32.xlu0 %v1676_v60  ;;  %1695 = vadd.xlane.f32.xlu1 %v1694_v3 }
 0x346   :  { %1683 = vadd.xlane.f32.xlu0 %v1682_v53  ;;  %1674 = vadd.xlane.f32.xlu1 %v1673_v5 }
 0x34a   :  { %1428 = vadd.xlane.f32.xlu0 %v1427_v6  ;;  %1692 = vadd.xlane.f32.xlu1 %v1691_v35 }
 0x34e   :  { %1434 = vadd.xlane.f32.xlu0 %v1433_v20  ;;  %1701 = vadd.xlane.f32.xlu1 %v1700_v59 }
 0x352   :  { %1698 = vadd.xlane.f32.xlu0 %v1697_v38  ;;  %1680 = vadd.xlane.f32.xlu1 %v1679_v26 }
 0x356   :  { %1437 = vadd.xlane.f32.xlu0 %v1436_v50  ;;  %1707 = vadd.xlane.f32.xlu1 %v1706_v54 }
 0x35a   :  { %1443 = vadd.xlane.f32.xlu0 %v1442_v37  ;;  %1686 = vadd.xlane.f32.xlu1 %v1685_v40 }
 0x35e   :  { %1704 = vadd.xlane.f32.xlu0 %v3637_v11  ;;  %1440 = vadd.xlane.f32.xlu1 %v3643_v28 }
 0x362   :  { %1449 = vadd.xlane.f32.xlu0 %v1448_v7  ;;  %1446 = vadd.xlane.f32.xlu1 %v3646_v14 }
 0x366   :  { %1455 = vadd.xlane.f32.xlu0 %v1454_v2  ;;  %1452 = vadd.xlane.f32.xlu1 %v1451_v29 }
 0x36a   :  { %1713 = vadd.xlane.f32.xlu0 %v3640_v36  ;;  %1458 = vadd.xlane.f32.xlu1 %v1457_v33 }
 0x36e   :  { %1719 = vadd.xlane.f32.xlu0 %v3657_v21  ;;  %1716 = vadd.xlane.f32.xlu1 %v3660_v15 }
 0x372   :  { %1725 = vadd.xlane.f32.xlu0 %v1724_v1  ;;  %1722 = vadd.xlane.f32.xlu1 %v3670_v63 }
 0x376   :  { %1731 = vadd.xlane.f32.xlu0 %v1730_v56  ;;  %1728 = vadd.xlane.f32.xlu1 %v1727_v32 }
 0x37a   :  { %1710 = vadd.xlane.f32.xlu0 %v3673_v45  ;;  %1734 = vadd.xlane.f32.xlu1 %v1733_v23 }
 0x37b   :  { %2286 = shalt.err (!%p2283_p12)
}
 0x37c   :  { %s2287_s28 = scalar_lea.hbm %s3823_s7, 768 }
 0x37d   :  { %p2288_p13 = scmp.ne.s32.totalorder %s3823_s7, %s2287_s28  ;;  %p2291_p0 = scmp.lt.u32.totalorder %s2287_s28, %s3823_s7 }
 0x37f   :  { %p2293_p1 = pnand %p2291_p0, %p2288_p13 }
 0x381   :  { %2296 = shalt.err (!%p2293_p1)
}
 0x382   :  { %s2311_s9 = smov 256   ;;  %s2312_s10 = smov 16   ;;  %v3753_v43 = vsub.s32 %v2555_v24, %v3972_v17  ;;  %vm1928_vm8 = vcmask 1041409   ;;  %vm1930_vm9 = vcmask 1042434   ;;  %vm1932_vm10 = vcmask 1043459  }
 0x383   :  { %1976 = dma.vmem_to_hbm [thread:$0]  %s1971_s26, 768, %s3823_s7, [#allocation4], %s2311_s9, %s2311_s9, %s2312_s10   ;;  %vm1934_vm11 = vcmask 1044484   ;;  %vm1936_vm12 = vcmask 1045509   ;;  %vm1938_vm13 = vcmask 1046534   ;;  %vm1940_vm14 = vcmask 1047559  }
 0x384   :  { %vm1959_vm15 = vcmask 15360  }
 0x3ab   :  { %v1396_v8 = vpop.xlane.xlu0 %1395  ;;  %v1390_v41 = vpop.xlane.xlu1 %1389 }
 0x3ac   :  { %v1736_v63 = vmax.f32 %v1390_v41, 1e-30  ;;  %v1738_v29 = vmax.f32 %v1396_v8, 1e-30 }
 0x3af   :  { %v1393_v42 = vpop.xlane.xlu0 %1392  ;;  %v1420_v31 = vpop.xlane.xlu1 %1419 }
 0x3b0   :  { %v1746_v12 = vmax.f32 %v1420_v31, 1e-30  ;;  %v1737_v7 = vmax.f32 %v1393_v42, 1e-30 }
 0x3b3   :  { %v1414_v11 = vpop.xlane.xlu0 %1413  ;;  %v1399_v36 = vpop.xlane.xlu1 %1398 }
 0x3b4   :  { %v1744_v47 = vmax.f32 %v1414_v11, 1e-30  ;;  %v1739_v25 = vmax.f32 %v1399_v36, 1e-30 }
 0x3b6   :  { %2204 = vrcp.f32 %v1744_v47 }
 0x3b7   :  { %v1402_v28 = vpop.xlane.xlu0 %1401  ;;  %v1417_v14 = vpop.xlane.xlu1 %1416  ;;  %2206 = vrcp.f32 %v1746_v12 }
 0x3b8   :  { %v1745_v2 = vmax.f32 %v1417_v14, 1e-30  ;;  %2208 = vrcp.f32 %v1737_v7  ;;  %v1740_v24 = vmax.f32 %v1402_v28, 1e-30 }
 0x3ba   :  { %2210 = vrcp.f32 %v1745_v2 }
 0x3bb   :  { %v1408_v55 = vpop.xlane.xlu0 %1407  ;;  %v1426_v61 = vpop.xlane.xlu1 %1425  ;;  %2212 = vrcp.f32 %v1736_v63 }
 0x3bc   :  { %v1748_v39 = vmax.f32 %v1426_v61, 1e-30  ;;  %2214 = vrcp.f32 %v1739_v25  ;;  %v1742_v48 = vmax.f32 %v1408_v55, 1e-30 }
 0x3bd   :  { %2216 = vrcp.f32 %v1738_v29 }
 0x3be   :  { %2218 = vrcp.f32 %v1748_v39 }
 0x3bf   :  { %v1666_v19 = vpop.xlane.xlu0 %1665  ;;  %v1405_v51 = vpop.xlane.xlu1 %1404 }
 0x3c0   :  { %v2205_v10 = vpop.eup %2204  ;;  %v1741_v56 = vmax.f32 %v1405_v51, 1e-30 }
 0x3c1   :  { %v2207_v34 = vpop.eup %2206 }
 0x3c2   :  { %v2209_v60 = vpop.eup %2208 }
 0x3c3   :  { %v1672_v21 = vpop.xlane.xlu0 %1671  ;;  %v3749_v15 = vpop.xlane.xlu1 %1431 }
 0x3c4   :  { %v2211_v13 = vpop.eup %2210  ;;  %v1750_v20 = vmax.f32 %v3749_v15, 1e-30 }
 0x3c5   :  { %v2213_v18 = vpop.eup %2212 }
 0x3c6   :  { %v1761_v4 = vmul.f32 %v2213_v18, %v1666_v19  ;;  %v2215_v35 = vpop.eup %2214 }
 0x3c7   :  { %v1423_v57 = vpop.xlane.xlu0 %1422  ;;  %v1411_v22 = vpop.xlane.xlu1 %1410 }
 0x3c8   :  { %v1747_v30 = vmax.f32 %v1423_v57, 1e-30  ;;  %v1743_v5 = vmax.f32 %v1411_v22, 1e-30  ;;  %v2217_v59 = vpop.eup %2216  ;;  %v1835_v8 = vrot.slane %v1761_v4, %v3753_v43 }
 0x3c9   :  { %v2219_v54 = vpop.eup %2218  ;;  %v1765_v0 = vmul.f32 %v2217_v59, %v1672_v21 }
 0x3ca   :  { %2220 = vrcp.f32 %v1747_v30 }
 0x3cb   :  { %v1690_v52 = vpop.xlane.xlu0 %1689  ;;  %v1669_v45 = vpop.xlane.xlu1 %1668  ;;  %2222 = vrcp.f32 %v1741_v56  ;;  %v1843_v47 = vrot.slane %v1765_v0, %v3753_v43 }
 0x3cc   :  { %v1777_v62 = vmul.f32 %v2205_v10, %v1690_v52  ;;  %2224 = vrcp.f32 %v1740_v24  ;;  %v1763_v23 = vmul.f32 %v2209_v60, %v1669_v45 }
 0x3cd   :  { %2226 = vrcp.f32 %v1742_v48 }
 0x3ce   :  { %v1867_v16 = vrot.slane %v1777_v62, %v3753_v43  ;;  %v1839_v58 = vrot.slane %v1763_v23, %v3753_v43  ;;  %2228 = vrcp.f32 %v1743_v5 }
 0x3cf   :  { %v1678_v33 = vpop.xlane.xlu0 %1677  ;;  %v1696_v27 = vpop.xlane.xlu1 %1695  ;;  %2230 = vrcp.f32 %v1750_v20 }
 0x3d0   :  { %v1781_v1 = vmul.f32 %v2207_v34, %v1696_v27  ;;  %v1929_v14 = vsel %vm1928_vm8, %v1839_v58, %v1835_v8 }
 0x3d1   :  { %v1931_v15 = vsel %vm1930_vm9, %v1843_v47, %v1929_v14 }
 0x3d2   :  { %v1875_v17 = vrot.slane %v1781_v1, %v3753_v43 }
 0x3d3   :  { %v1684_v46 = vpop.xlane.xlu0 %1683  ;;  %v1675_v49 = vpop.xlane.xlu1 %1674 }
 0x3d4   :  { %v1767_v38 = vmul.f32 %v2215_v35, %v1675_v49  ;;  %v2221_v40 = vpop.eup %2220 }
 0x3d5   :  { %v2223_v31 = vpop.eup %2222 }
 0x3d6   :  { %v2225_v28 = vpop.eup %2224  ;;  %v1847_v55 = vrot.slane %v1767_v38, %v3753_v43 }
 0x3d7   :  { %v1429_v3 = vpop.xlane.xlu0 %1428  ;;  %v1693_v32 = vpop.xlane.xlu1 %1692  ;;  %v1769_v19 = vmul.f32 %v2225_v28, %v1678_v33 }
 0x3d8   :  { %v1779_v53 = vmul.f32 %v2211_v13, %v1693_v32  ;;  %v1749_v26 = vmax.f32 %v1429_v3, 1e-30  ;;  %v2227_v7 = vpop.eup %2226  ;;  %v1933_v2 = vsel %vm1932_vm10, %v1847_v55, %v1931_v15 }
 0x3d9   :  { %v1851_v63 = vrot.slane %v1769_v19, %v3753_v43  ;;  %v1773_v62 = vmul.f32 %v2227_v7, %v1684_v46  ;;  %v2229_v25 = vpop.eup %2228 }
 0x3da   :  { %v1871_v6 = vrot.slane %v1779_v53, %v3753_v43  ;;  %2232 = vrcp.f32 %v1749_v26  ;;  %v2231_v39 = vpop.eup %2230 }
 0x3db   :  { %v3758_v44 = vpop.xlane.xlu0 %1434  ;;  %v1702_v9 = vpop.xlane.xlu1 %1701  ;;  %v1859_v27 = vrot.slane %v1773_v62, %v3753_v43 }
 0x3dc   :  { %v1942_v50 = vsel %vm1928_vm8, %v1871_v6, %v1867_v16  ;;  %v1785_v41 = vmul.f32 %v2219_v54, %v1702_v9  ;;  %v1935_v16 = vsel %vm1934_vm11, %v1851_v63, %v1933_v2 }
 0x3dd   :  { %v1943_v37 = vsel %vm1930_vm9, %v1875_v17, %v1942_v50  ;;  %v1751_v50 = vmax.f32 %v3758_v44, 1e-30 }
 0x3de   :  { %v1883_v12 = vrot.slane %v1785_v41, %v3753_v43 }
 0x3df   :  { %v1699_v42 = vpop.xlane.xlu0 %1698  ;;  %v1681_v36 = vpop.xlane.xlu1 %1680 }
 0x3e0   :  { %v1783_v11 = vmul.f32 %v2221_v40, %v1699_v42  ;;  %v1771_v61 = vmul.f32 %v2223_v31, %v1681_v36 }
 0x3e2   :  { %v1879_v51 = vrot.slane %v1783_v11, %v3753_v43  ;;  %v1855_v10 = vrot.slane %v1771_v61, %v3753_v43 }
 0x3e3   :  { %v1438_v21 = vpop.xlane.xlu0 %1437  ;;  %v1708_v22 = vpop.xlane.xlu1 %1707 }
 0x3e4   :  { %v1944_v57 = vsel %vm1932_vm10, %v1879_v51, %v1943_v37  ;;  %v1937_v33 = vsel %vm1936_vm12, %v1855_v10, %v1935_v16  ;;  %v2233_v30 = vpop.eup %2232  ;;  %v1789_v1 = vmul.f32 %v2231_v39, %v1708_v22  ;;  %v1752_v17 = vmax.f32 %v1438_v21, 1e-30 }
 0x3e5   :  { %v1945_v52 = vsel %vm1934_vm11, %v1883_v12, %v1944_v57  ;;  %v1939_v46 = vsel %vm1938_vm13, %v1859_v27, %v1937_v33 }
 0x3e6   :  { %v1891_v23 = vrot.slane %v1789_v1, %v3753_v43  ;;  %2234 = vrcp.f32 %v1752_v17 }
 0x3e7   :  { %v1444_v45 = vpop.xlane.xlu0 %1443  ;;  %v1687_v29 = vpop.xlane.xlu1 %1686 }
 0x3e8   :  { %v1775_v34 = vmul.f32 %v2229_v25, %v1687_v29  ;;  %v1754_v48 = vmax.f32 %v1444_v45, 1e-30 }
 0x3ea   :  { %v1863_v56 = vrot.slane %v1775_v34, %v3753_v43  ;;  %2236 = vrcp.f32 %v1754_v48 }
 0x3eb   :  { %v1705_v24 = vpop.xlane.xlu0 %1704  ;;  %v1441_v60 = vpop.xlane.xlu1 %1440 }
 0x3ec   :  { %v1787_v49 = vmul.f32 %v2233_v30, %v1705_v24  ;;  %v1941_v3 = vsel %vm1940_vm14, %v1863_v56, %v1939_v46  ;;  %v1753_v32 = vmax.f32 %v1441_v60, 1e-30 }
 0x3ed   :  { %1960 = vst.msk [vmem:[%s3822_s6] sm:$0xff] %vm1959_vm15, %v1941_v3 }
 0x3ee   :  { %v1887_v13 = vrot.slane %v1787_v49, %v3753_v43  ;;  %2238 = vrcp.f32 %v1753_v32 }
 0x3ef   :  { %v1450_v53 = vpop.xlane.xlu0 %1449  ;;  %v1447_v5 = vpop.xlane.xlu1 %1446 }
 0x3f0   :  { %v1946_v18 = vsel %vm1936_vm12, %v1887_v13, %v1945_v52  ;;  %v1756_v4 = vmax.f32 %v1450_v53, 1e-30  ;;  %v1755_v35 = vmax.f32 %v1447_v5, 1e-30  ;;  %v2235_v54 = vpop.eup %2234 }
 0x3f1   :  { %v1947_v6 = vsel %vm1938_vm13, %v1891_v23, %v1946_v18 }
 0x3f2   :  { %2240 = vrcp.f32 %v1756_v4 }
 0x3f3   :  { %v1456_v20 = vpop.xlane.xlu0 %1455  ;;  %v1453_v9 = vpop.xlane.xlu1 %1452  ;;  %2242 = vrcp.f32 %v1755_v35 }
 0x3f4   :  { %v1758_v59 = vmax.f32 %v1456_v20, 1e-30  ;;  %v1757_v58 = vmax.f32 %v1453_v9, 1e-30  ;;  %v2237_v37 = vpop.eup %2236 }
 0x3f6   :  { %2244 = vrcp.f32 %v1758_v59 }
 0x3f7   :  { %v1714_v38 = vpop.xlane.xlu0 %1713  ;;  %v1459_v26 = vpop.xlane.xlu1 %1458  ;;  %2246 = vrcp.f32 %v1757_v58 }
 0x3f8   :  { %v1759_v0 = vmax.f32 %v1459_v26, 1e-30  ;;  %v1793_v40 = vmul.f32 %v2235_v54, %v1714_v38  ;;  %v2239_v41 = vpop.eup %2238  ;;  %2248 = vrcp.f32 %v1751_v50 }
 0x3fa   :  { %2250 = vrcp.f32 %v1759_v0  ;;  %v1899_v28 = vrot.slane %v1793_v40, %v3753_v43 }
 0x3fb   :  { %v1720_v8 = vpop.xlane.xlu0 %1719  ;;  %v1717_v31 = vpop.xlane.xlu1 %1716 }
 0x3fc   :  { %v1797_v42 = vmul.f32 %v2237_v37, %v1720_v8  ;;  %v1795_v11 = vmul.f32 %v2239_v41, %v1717_v31  ;;  %v2241_v36 = vpop.eup %2240 }
 0x3fd   :  { %v2243_v44 = vpop.eup %2242 }
 0x3fe   :  { %v1903_v14 = vrot.slane %v1795_v11, %v3753_v43  ;;  %v1907_v61 = vrot.slane %v1797_v42, %v3753_v43 }
 0x3ff   :  { %v1726_v55 = vpop.xlane.xlu0 %1725  ;;  %v1723_v19 = vpop.xlane.xlu1 %1722 }
 0x400   :  { %v1801_v47 = vmul.f32 %v2241_v36, %v1726_v55  ;;  %v1949_v51 = vsel %vm1928_vm8, %v1903_v14, %v1899_v28  ;;  %v1799_v12 = vmul.f32 %v2243_v44, %v1723_v19  ;;  %v2245_v21 = vpop.eup %2244 }
 0x401   :  { %v2247_v22 = vpop.eup %2246  ;;  %v1950_v2 = vsel %vm1930_vm9, %v1907_v61, %v1949_v51 }
 0x402   :  { %v1911_v15 = vrot.slane %v1799_v12, %v3753_v43  ;;  %v1915_v7 = vrot.slane %v1801_v47, %v3753_v43  ;;  %v2249_v45 = vpop.eup %2248 }
 0x403   :  { %v1732_v57 = vpop.xlane.xlu0 %1731  ;;  %v1729_v52 = vpop.xlane.xlu1 %1728 }
 0x404   :  { %v1805_v10 = vmul.f32 %v2245_v21, %v1732_v57  ;;  %v1951_v63 = vsel %vm1932_vm10, %v1911_v15, %v1950_v2  ;;  %v1803_v62 = vmul.f32 %v2247_v22, %v1729_v52  ;;  %v2251_v29 = vpop.eup %2250 }
 0x405   :  { %v1952_v34 = vsel %vm1934_vm11, %v1915_v7, %v1951_v63 }
 0x406   :  { %v1919_v25 = vrot.slane %v1803_v62, %v3753_v43  ;;  %v1923_v33 = vrot.slane %v1805_v10, %v3753_v43 }
 0x407   :  { %v1711_v16 = vpop.xlane.xlu0 %1710  ;;  %v1735_v27 = vpop.xlane.xlu1 %1734 }
 0x408   :  { %v1791_v39 = vmul.f32 %v2249_v45, %v1711_v16  ;;  %v1953_v30 = vsel %vm1936_vm12, %v1919_v25, %v1952_v34  ;;  %v1807_v1 = vmul.f32 %v2251_v29, %v1735_v27 }
 0x409   :  { %v1954_v46 = vsel %vm1938_vm13, %v1923_v33, %v1953_v30 }
 0x40a   :  { %v1895_v56 = vrot.slane %v1791_v39, %v3753_v43  ;;  %v1927_v24 = vrot.slane %v1807_v1, %v3753_v43 }
 0x40c   :  { %v1948_v17 = vsel %vm1940_vm14, %v1895_v56, %v1947_v6  ;;  %v1955_v49 = vsel %vm1940_vm14, %v1927_v24, %v1954_v46 }
 0x40d   :  { %1961 = vst.msk [vmem:[%s3822_s6 + $0x8] sm:$0xff] %vm1959_vm15, %v1948_v17  ;;  %1962 = vst.msk [vmem:[%s3822_s6 + $0x10] sm:$0xff] %vm1959_vm15, %v1955_v49 }
 0x40e   :  { %2299 = dma.done.wait [#allocation4], 768  }
 0x40f   :  { %2300 = vsyncadd [#allocation4], 4294966528 }
 0x410   :  { %1982 = vsyncpa [#allocation3], 1 }
 0x411   :  { %1983 = vsyncpa [#allocation4], 1 }

</bundles_post_ra>
